<compile_context>
chip_gen: v7x
topology: tpu7x:2x2x1
jax: 0.10.0
libtpu: 0.0.40
codegen_flags: <defaults>
</compile_context>

<pallas_src>
import functools
import math

import jax
import jax.numpy as jnp
from jax.experimental import pallas as pl
from jax.experimental.pallas import tpu as pltpu


def mlp_kernel(x_ref, w1_ref, b1_ref, w2_ref, b2_ref, w3_ref, b3_ref,
               w4t_ref, b4_ref, o_ref, *, cast_x_bf16):
    # x_ref: (TB, D) batch tile; weights/biases are full arrays resident in VMEM.
    x = x_ref[...]
    if cast_x_bf16:
        # Cast on the VPU inside the kernel so x is only read from HBM once.
        x = x.astype(jnp.bfloat16)
    h = jnp.dot(x, w1_ref[...], preferred_element_type=jnp.float32) + b1_ref[...]
    h = jnp.maximum(h, 0.0)
    h = jnp.dot(h, w2_ref[...], preferred_element_type=jnp.float32) + b2_ref[...]
    h = jnp.maximum(h, 0.0)
    h = jnp.dot(h, w3_ref[...], preferred_element_type=jnp.float32) + b3_ref[...]
    h = jnp.maximum(h, 0.0)
    # 16 -> 1 head on VPU/XLU: broadcast-mul with the (1,16) transposed weight row and
    # lane-reduce. Avoids an N=1 MXU matmul (wasted lanes + drain stalls).
    o_ref[...] = jnp.sum(h * w4t_ref[...], axis=-1, keepdims=True) + b4_ref[...]


def init_params(key, in_features):
    """PyTorch nn.Linear-style init: U(-k, k) with k = 1/sqrt(fan_in)."""
    sizes = [(in_features, 256), (256, 128), (128, 16), (16, 1)]
    params = []
    for fan_in, fan_out in sizes:
        key, kw, kb = jax.random.split(key, 3)
        bound = 1.0 / math.sqrt(fan_in)
        w = jax.random.uniform(kw, (fan_in, fan_out), jnp.float32, -bound, bound)
        b = jax.random.uniform(kb, (1, fan_out), jnp.float32, -bound, bound)
        params += [w, b]
    return tuple(params)


def _round_up(n, m):
    return ((n + m - 1) // m) * m


def _select_batch_tile(B, batch_tile):
    if B <= 64:
        # Tiny batch: one exact block (block dims == array dims is always layout-legal).
        return B
    # Otherwise guarantee at least 2 grid tiles so ("parallel",) can shard across both
    # TensorCores on v7x; keep the sublane dim a multiple of 8; cap at batch_tile.
    return min(batch_tile, _round_up(pl.cdiv(B, 2), 8))


def orientation_forward(x, params, *, batch_tile=1024, first_layer_bf16=False):
    """Forward pass of OrientationModel. x is NCHW like the PyTorch module."""
    assert batch_tile % 8 == 0, "batch_tile must be a multiple of 8 (sublane width)"
    B = x.shape[0]
    xf = x.reshape(B, -1).astype(jnp.float32)        # torch.nn.Flatten (row-major)
    D = xf.shape[1]
    w1, b1, w2, b2, w3, b3, w4, b4 = params
    assert w4.shape == (16, 1), w4.shape             # reshape below relies on column layout

    if first_layer_bf16:
        # Params are tiny (one-time cast); x itself is cast inside the kernel, so no
        # extra HBM pass over the activation tensor.
        w1 = w1.astype(jnp.bfloat16)

    tb = _select_batch_tile(B, batch_tile)
    grid = (pl.cdiv(B, tb),)

    flops = 2 * B * (D * 256 + 256 * 128 + 128 * 16 + 16 * 1)
    param_bytes = sum(int(p.size) * p.dtype.itemsize
                      for p in (w1, b1, w2, b2, w3, b3, w4, b4))
    cost = pl.CostEstimate(
        flops=flops,
        transcendentals=0,
        bytes_accessed=int(xf.size) * xf.dtype.itemsize + param_bytes + B * 4)

    kernel = functools.partial(mlp_kernel, cast_x_bf16=first_layer_bf16)
    full = lambda i: (0, 0)   # grid-invariant operands: same block every step

    def build_and_run(single_buffer_weights):
        if single_buffer_weights:
            wspec = lambda shape: pl.BlockSpec(shape, full, pipeline_mode=pl.Buffered(1))
        else:
            wspec = lambda shape: pl.BlockSpec(shape, full)
        return pl.pallas_call(
            kernel,
            out_shape=jax.ShapeDtypeStruct((B, 1), jnp.float32),
            grid=grid,
            in_specs=[
                pl.BlockSpec((tb, D), lambda i: (i, 0)),   # x: streamed batch tile
                wspec((D, 256)), wspec((1, 256)),          # w1, b1
                wspec((256, 128)), wspec((1, 128)),        # w2, b2
                wspec((128, 16)), wspec((1, 16)),          # w3, b3
                wspec((1, 16)), wspec((1, 1)),             # w4^T (VPU path), b4
            ],
            out_specs=pl.BlockSpec((tb, 1), lambda i: (i, 0)),
            compiler_params=pltpu.CompilerParams(
                dimension_semantics=("parallel",),
                vmem_limit_bytes=32 * 1024 * 1024),
            cost_estimate=cost,
        )(xf, w1, b1, w2, b2, w3, b3, w4.reshape(1, 16), b4)

    try:
        return build_and_run(True)
    except Exception:
        # Fallback for JAX builds where BlockSpec.pipeline_mode / pl.Buffered is not
        # honoured by the pallas_call TPU pipeline; only costs ~1.2 MiB extra VMEM.
        return build_and_run(False)


def reference_forward(x, params):
    """Pure-JAX f32 reference (highest matmul precision)."""
    B = x.shape[0]
    h = x.reshape(B, -1).astype(jnp.float32)
    w1, b1, w2, b2, w3, b3, w4, b4 = params
    h = jnp.maximum(jnp.dot(h, w1.astype(jnp.float32), precision="highest") + b1, 0.0)
    h = jnp.maximum(jnp.dot(h, w2, precision="highest") + b2, 0.0)
    h = jnp.maximum(jnp.dot(h, w3, precision="highest") + b3, 0.0)
    return jnp.dot(h, w4, precision="highest") + b4


if __name__ == "__main__":
    key = jax.random.PRNGKey(0)
    k_x1, k_x2, k_p = jax.random.split(key, 3)

    # NCHW input consistent with Flatten -> LazyLinear: (B, 4, 16, 16) -> 1024 features.
    params = init_params(k_p, in_features=4 * 16 * 16)

    # 1) Tiny batch: single exact block path.
    x1 = jax.random.normal(k_x1, (2, 4, 16, 16), jnp.float32)
    y1 = jax.block_until_ready(orientation_forward(x1, params))
    r1 = reference_forward(x1, params)
    assert y1.shape == (2, 1), y1.shape
    # 2e-3 tolerance absorbs XLA's default bf16-pass f32 matmul precision on TPU
    # (semantics are unchanged; this is purely TPU matmul rounding-mode slack).
    assert jnp.allclose(y1, r1, atol=2e-3, rtol=2e-3), (y1, r1)

    # 2) Multi-tile path with a partial last block (B=100 -> tb=56, grid=(2,)),
    #    exercising the >=2-tile v7x sharding branch and padded-row handling.
    x2 = jax.random.normal(k_x2, (100, 4, 16, 16), jnp.float32)
    y2 = jax.block_until_ready(orientation_forward(x2, params))
    r2 = reference_forward(x2, params)
    assert y2.shape == (100, 1), y2.shape
    assert jnp.allclose(y2, r2, atol=2e-3, rtol=2e-3), float(jnp.max(jnp.abs(y2 - r2)))

    # 3) bf16 first layer (perf mode): bf16 inputs on a K=1024 dot -> looser tolerance.
    y3 = jax.block_until_ready(orientation_forward(x2, params, first_layer_bf16=True))
    assert jnp.allclose(y3, r2, atol=5e-2, rtol=5e-2), float(jnp.max(jnp.abs(y3 - r2)))

    print("KERNEL_OK")
</pallas_src>

<mosaic_0001>
module attributes {stable_mosaic.version = 11 : i64} {
  func.func @mlp_kernel(%arg0: i32, %arg1: memref<2x1024xf32, #tpu.memory_space<vmem>>, %arg2: memref<1024x256xf32, #tpu.memory_space<vmem>>, %arg3: memref<1x256xf32, #tpu.memory_space<vmem>>, %arg4: memref<256x128xf32, #tpu.memory_space<vmem>>, %arg5: memref<1x128xf32, #tpu.memory_space<vmem>>, %arg6: memref<128x16xf32, #tpu.memory_space<vmem>>, %arg7: memref<1x16xf32, #tpu.memory_space<vmem>>, %arg8: memref<1x16xf32, #tpu.memory_space<vmem>>, %arg9: memref<1x1xf32, #tpu.memory_space<vmem>>, %arg10: memref<2x1xf32, #tpu.memory_space<vmem>>) attributes {dimension_semantics = [#tpu.dimension_semantics<parallel>], iteration_bounds = array<i64: 1>, scalar_prefetch = 0 : i64, scratch_operands = 0 : i64, tpu.core_type = #tpu.core_type<tc>, window_params = [{transform_indices = @transform_0, window_bounds = array<i64: 2, 1024>}, {pipeline_mode = #tpu.pipeline_mode<synchronous>, transform_indices = @transform_1, window_bounds = array<i64: 1024, 256>}, {pipeline_mode = #tpu.pipeline_mode<synchronous>, transform_indices = @transform_2, window_bounds = array<i64: 1, 256>}, {pipeline_mode = #tpu.pipeline_mode<synchronous>, transform_indices = @transform_3, window_bounds = array<i64: 256, 128>}, {pipeline_mode = #tpu.pipeline_mode<synchronous>, transform_indices = @transform_4, window_bounds = array<i64: 1, 128>}, {pipeline_mode = #tpu.pipeline_mode<synchronous>, transform_indices = @transform_5, window_bounds = array<i64: 128, 16>}, {pipeline_mode = #tpu.pipeline_mode<synchronous>, transform_indices = @transform_6, window_bounds = array<i64: 1, 16>}, {pipeline_mode = #tpu.pipeline_mode<synchronous>, transform_indices = @transform_7, window_bounds = array<i64: 1, 16>}, {pipeline_mode = #tpu.pipeline_mode<synchronous>, transform_indices = @transform_8, window_bounds = array<i64: 1, 1>}, {transform_indices = @transform_9, window_bounds = array<i64: 2, 1>}]} {
    %c0 = arith.constant 0 : index
    %c0_0 = arith.constant 0 : index
    %0 = vector.load %arg1[%c0, %c0_0] : memref<2x1024xf32, #tpu.memory_space<vmem>>, vector<2x1024xf32>
    %c0_1 = arith.constant 0 : index
    %c0_2 = arith.constant 0 : index
    %1 = vector.load %arg2[%c0_1, %c0_2] : memref<1024x256xf32, #tpu.memory_space<vmem>>, vector<1024x256xf32>
    %cst = arith.constant dense<0.000000e+00> : vector<2x256xf32>
    %2 = tpu.matmul %0, %1, %cst {dimension_numbers = #tpu.dot_dimension_numbers<[1], [0], [0], [1], [0, 0, 1, 1], [], []>} : vector<2x1024xf32>, vector<1024x256xf32>, vector<2x256xf32> -> vector<2x256xf32>
    %c0_3 = arith.constant 0 : index
    %c0_4 = arith.constant 0 : index
    %3 = vector.load %arg3[%c0_3, %c0_4] : memref<1x256xf32, #tpu.memory_space<vmem>>, vector<1x256xf32>
    %4 = vector.broadcast %3 : vector<1x256xf32> to vector<2x256xf32>
    %5 = arith.addf %2, %4 : vector<2x256xf32>
    %cst_5 = arith.constant 0.000000e+00 : f32
    %6 = vector.broadcast %cst_5 : f32 to vector<2x256xf32>
    %7 = arith.maximumf %5, %6 : vector<2x256xf32>
    %c0_6 = arith.constant 0 : index
    %c0_7 = arith.constant 0 : index
    %8 = vector.load %arg4[%c0_6, %c0_7] : memref<256x128xf32, #tpu.memory_space<vmem>>, vector<256x128xf32>
    %cst_8 = arith.constant dense<0.000000e+00> : vector<2x128xf32>
    %9 = tpu.matmul %7, %8, %cst_8 {dimension_numbers = #tpu.dot_dimension_numbers<[1], [0], [0], [1], [0, 0, 1, 1], [], []>} : vector<2x256xf32>, vector<256x128xf32>, vector<2x128xf32> -> vector<2x128xf32>
    %c0_9 = arith.constant 0 : index
    %c0_10 = arith.constant 0 : index
    %10 = vector.load %arg5[%c0_9, %c0_10] : memref<1x128xf32, #tpu.memory_space<vmem>>, vector<1x128xf32>
    %11 = vector.broadcast %10 : vector<1x128xf32> to vector<2x128xf32>
    %12 = arith.addf %9, %11 : vector<2x128xf32>
    %cst_11 = arith.constant 0.000000e+00 : f32
    %13 = vector.broadcast %cst_11 : f32 to vector<2x128xf32>
    %14 = arith.maximumf %12, %13 : vector<2x128xf32>
    %c0_12 = arith.constant 0 : index
    %c0_13 = arith.constant 0 : index
    %15 = vector.load %arg6[%c0_12, %c0_13] : memref<128x16xf32, #tpu.memory_space<vmem>>, vector<128x16xf32>
    %cst_14 = arith.constant dense<0.000000e+00> : vector<2x16xf32>
    %16 = tpu.matmul %14, %15, %cst_14 {dimension_numbers = #tpu.dot_dimension_numbers<[1], [0], [0], [1], [0, 0, 1, 1], [], []>} : vector<2x128xf32>, vector<128x16xf32>, vector<2x16xf32> -> vector<2x16xf32>
    %c0_15 = arith.constant 0 : index
    %c0_16 = arith.constant 0 : index
    %17 = vector.load %arg7[%c0_15, %c0_16] : memref<1x16xf32, #tpu.memory_space<vmem>>, vector<1x16xf32>
    %18 = vector.broadcast %17 : vector<1x16xf32> to vector<2x16xf32>
    %19 = arith.addf %16, %18 : vector<2x16xf32>
    %cst_17 = arith.constant 0.000000e+00 : f32
    %20 = vector.broadcast %cst_17 : f32 to vector<2x16xf32>
    %21 = arith.maximumf %19, %20 : vector<2x16xf32>
    %c0_18 = arith.constant 0 : index
    %c0_19 = arith.constant 0 : index
    %22 = vector.load %arg8[%c0_18, %c0_19] : memref<1x16xf32, #tpu.memory_space<vmem>>, vector<1x16xf32>
    %23 = vector.broadcast %22 : vector<1x16xf32> to vector<2x16xf32>
    %24 = arith.mulf %21, %23 : vector<2x16xf32>
    %cst_20 = arith.constant dense<0.000000e+00> : vector<2xf32>
    %25 = vector.multi_reduction <add>, %24, %cst_20 [1] : vector<2x16xf32> to vector<2xf32>
    %26 = vector.shape_cast %25 : vector<2xf32> to vector<2x1xf32>
    %c0_21 = arith.constant 0 : index
    %c0_22 = arith.constant 0 : index
    %27 = vector.load %arg9[%c0_21, %c0_22] : memref<1x1xf32, #tpu.memory_space<vmem>>, vector<1x1xf32>
    %28 = vector.broadcast %27 : vector<1x1xf32> to vector<2x1xf32>
    %29 = arith.addf %26, %28 : vector<2x1xf32>
    %c0_23 = arith.constant 0 : index
    %c0_24 = arith.constant 0 : index
    %30 = vector.load %arg10[%c0_23, %c0_24] : memref<2x1xf32, #tpu.memory_space<vmem>>, vector<2x1xf32>
    tpu.vector_store %arg10[%c0_23, %c0_24], %29 {strides = array<i32>} : memref<2x1xf32, #tpu.memory_space<vmem>>, vector<2x1xf32>,
    return
  }
  func.func @transform_0(%arg0: i32) -> (i32, i32) {
    %c0_i32 = arith.constant 0 : i32
    %c0_i32_0 = arith.constant 0 : i32
    return %arg0, %c0_i32 : i32, i32
  }
  func.func @transform_1(%arg0: i32) -> (i32, i32) {
    %c0_i32 = arith.constant 0 : i32
    %c0_i32_0 = arith.constant 0 : i32
    %c0_i32_1 = arith.constant 0 : i32
    return %c0_i32, %c0_i32_0 : i32, i32
  }
  func.func @transform_2(%arg0: i32) -> (i32, i32) {
    %c0_i32 = arith.constant 0 : i32
    %c0_i32_0 = arith.constant 0 : i32
    %c0_i32_1 = arith.constant 0 : i32
    return %c0_i32, %c0_i32_0 : i32, i32
  }
  func.func @transform_3(%arg0: i32) -> (i32, i32) {
    %c0_i32 = arith.constant 0 : i32
    %c0_i32_0 = arith.constant 0 : i32
    %c0_i32_1 = arith.constant 0 : i32
    return %c0_i32, %c0_i32_0 : i32, i32
  }
  func.func @transform_4(%arg0: i32) -> (i32, i32) {
    %c0_i32 = arith.constant 0 : i32
    %c0_i32_0 = arith.constant 0 : i32
    %c0_i32_1 = arith.constant 0 : i32
    return %c0_i32, %c0_i32_0 : i32, i32
  }
  func.func @transform_5(%arg0: i32) -> (i32, i32) {
    %c0_i32 = arith.constant 0 : i32
    %c0_i32_0 = arith.constant 0 : i32
    %c0_i32_1 = arith.constant 0 : i32
    return %c0_i32, %c0_i32_0 : i32, i32
  }
  func.func @transform_6(%arg0: i32) -> (i32, i32) {
    %c0_i32 = arith.constant 0 : i32
    %c0_i32_0 = arith.constant 0 : i32
    %c0_i32_1 = arith.constant 0 : i32
    return %c0_i32, %c0_i32_0 : i32, i32
  }
  func.func @transform_7(%arg0: i32) -> (i32, i32) {
    %c0_i32 = arith.constant 0 : i32
    %c0_i32_0 = arith.constant 0 : i32
    %c0_i32_1 = arith.constant 0 : i32
    return %c0_i32, %c0_i32_0 : i32, i32
  }
  func.func @transform_8(%arg0: i32) -> (i32, i32) {
    %c0_i32 = arith.constant 0 : i32
    %c0_i32_0 = arith.constant 0 : i32
    %c0_i32_1 = arith.constant 0 : i32
    return %c0_i32, %c0_i32_0 : i32, i32
  }
  func.func @transform_9(%arg0: i32) -> (i32, i32) {
    %c0_i32 = arith.constant 0 : i32
    %c0_i32_0 = arith.constant 0 : i32
    return %arg0, %c0_i32 : i32, i32
  }
}

module attributes {stable_mosaic.version = 11 : i64} {
  func.func @mlp_kernel(%arg0: i32, %arg1: memref<2x1024xf32, #tpu.memory_space<vmem>>, %arg2: memref<1024x256xf32, #tpu.memory_space<vmem>>, %arg3: memref<1x256xf32, #tpu.memory_space<vmem>>, %arg4: memref<256x128xf32, #tpu.memory_space<vmem>>, %arg5: memref<1x128xf32, #tpu.memory_space<vmem>>, %arg6: memref<128x16xf32, #tpu.memory_space<vmem>>, %arg7: memref<1x16xf32, #tpu.memory_space<vmem>>, %arg8: memref<1x16xf32, #tpu.memory_space<vmem>>, %arg9: memref<1x1xf32, #tpu.memory_space<vmem>>, %arg10: memref<2x1xf32, #tpu.memory_space<vmem>>) attributes {dimension_semantics = [#tpu.dimension_semantics<parallel>], iteration_bounds = array<i64: 1>, scalar_prefetch = 0 : i64, scratch_operands = 0 : i64, tpu.core_type = #tpu.core_type<tc>, window_params = [{transform_indices = @transform_0, window_bounds = array<i64: 2, 1024>}, {pipeline_mode = #tpu.pipeline_mode<synchronous>, transform_indices = @transform_1, window_bounds = array<i64: 1024, 256>}, {pipeline_mode = #tpu.pipeline_mode<synchronous>, transform_indices = @transform_2, window_bounds = array<i64: 1, 256>}, {pipeline_mode = #tpu.pipeline_mode<synchronous>, transform_indices = @transform_3, window_bounds = array<i64: 256, 128>}, {pipeline_mode = #tpu.pipeline_mode<synchronous>, transform_indices = @transform_4, window_bounds = array<i64: 1, 128>}, {pipeline_mode = #tpu.pipeline_mode<synchronous>, transform_indices = @transform_5, window_bounds = array<i64: 128, 16>}, {pipeline_mode = #tpu.pipeline_mode<synchronous>, transform_indices = @transform_6, window_bounds = array<i64: 1, 16>}, {pipeline_mode = #tpu.pipeline_mode<synchronous>, transform_indices = @transform_7, window_bounds = array<i64: 1, 16>}, {pipeline_mode = #tpu.pipeline_mode<synchronous>, transform_indices = @transform_8, window_bounds = array<i64: 1, 1>}, {transform_indices = @transform_9, window_bounds = array<i64: 2, 1>}]} {
    %c0 = arith.constant 0 : index
    %c0_0 = arith.constant 0 : index
    %0 = vector.load %arg1[%c0, %c0_0] : memref<2x1024xf32, #tpu.memory_space<vmem>>, vector<2x1024xf32>
    %c0_1 = arith.constant 0 : index
    %c0_2 = arith.constant 0 : index
    %1 = vector.load %arg2[%c0_1, %c0_2] : memref<1024x256xf32, #tpu.memory_space<vmem>>, vector<1024x256xf32>
    %cst = arith.constant dense<0.000000e+00> : vector<2x256xf32>
    %2 = tpu.matmul %0, %1, %cst {dimension_numbers = #tpu.dot_dimension_numbers<[1], [0], [0], [1], [0, 0, 1, 1], [], []>} : vector<2x1024xf32>, vector<1024x256xf32>, vector<2x256xf32> -> vector<2x256xf32>
    %c0_3 = arith.constant 0 : index
    %c0_4 = arith.constant 0 : index
    %3 = vector.load %arg3[%c0_3, %c0_4] : memref<1x256xf32, #tpu.memory_space<vmem>>, vector<1x256xf32>
    %4 = vector.broadcast %3 : vector<1x256xf32> to vector<2x256xf32>
    %5 = arith.addf %2, %4 : vector<2x256xf32>
    %cst_5 = arith.constant 0.000000e+00 : f32
    %6 = vector.broadcast %cst_5 : f32 to vector<2x256xf32>
    %7 = arith.maximumf %5, %6 : vector<2x256xf32>
    %c0_6 = arith.constant 0 : index
    %c0_7 = arith.constant 0 : index
    %8 = vector.load %arg4[%c0_6, %c0_7] : memref<256x128xf32, #tpu.memory_space<vmem>>, vector<256x128xf32>
    %cst_8 = arith.constant dense<0.000000e+00> : vector<2x128xf32>
    %9 = tpu.matmul %7, %8, %cst_8 {dimension_numbers = #tpu.dot_dimension_numbers<[1], [0], [0], [1], [0, 0, 1, 1], [], []>} : vector<2x256xf32>, vector<256x128xf32>, vector<2x128xf32> -> vector<2x128xf32>
    %c0_9 = arith.constant 0 : index
    %c0_10 = arith.constant 0 : index
    %10 = vector.load %arg5[%c0_9, %c0_10] : memref<1x128xf32, #tpu.memory_space<vmem>>, vector<1x128xf32>
    %11 = vector.broadcast %10 : vector<1x128xf32> to vector<2x128xf32>
    %12 = arith.addf %9, %11 : vector<2x128xf32>
    %cst_11 = arith.constant 0.000000e+00 : f32
    %13 = vector.broadcast %cst_11 : f32 to vector<2x128xf32>
    %14 = arith.maximumf %12, %13 : vector<2x128xf32>
    %c0_12 = arith.constant 0 : index
    %c0_13 = arith.constant 0 : index
    %15 = vector.load %arg6[%c0_12, %c0_13] : memref<128x16xf32, #tpu.memory_space<vmem>>, vector<128x16xf32>
    %cst_14 = arith.constant dense<0.000000e+00> : vector<2x16xf32>
    %16 = tpu.matmul %14, %15, %cst_14 {dimension_numbers = #tpu.dot_dimension_numbers<[1], [0], [0], [1], [0, 0, 1, 1], [], []>} : vector<2x128xf32>, vector<128x16xf32>, vector<2x16xf32> -> vector<2x16xf32>
    %c0_15 = arith.constant 0 : index
    %c0_16 = arith.constant 0 : index
    %17 = vector.load %arg7[%c0_15, %c0_16] : memref<1x16xf32, #tpu.memory_space<vmem>>, vector<1x16xf32>
    %18 = vector.broadcast %17 : vector<1x16xf32> to vector<2x16xf32>
    %19 = arith.addf %16, %18 : vector<2x16xf32>
    %cst_17 = arith.constant 0.000000e+00 : f32
    %20 = vector.broadcast %cst_17 : f32 to vector<2x16xf32>
    %21 = arith.maximumf %19, %20 : vector<2x16xf32>
    %c0_18 = arith.constant 0 : index
    %c0_19 = arith.constant 0 : index
    %22 = vector.load %arg8[%c0_18, %c0_19] : memref<1x16xf32, #tpu.memory_space<vmem>>, vector<1x16xf32>
    %23 = vector.broadcast %22 : vector<1x16xf32> to vector<2x16xf32>
    %24 = arith.mulf %21, %23 : vector<2x16xf32>
    %cst_20 = arith.constant dense<0.000000e+00> : vector<2xf32>
    %25 = vector.multi_reduction <add>, %24, %cst_20 [1] : vector<2x16xf32> to vector<2xf32>
    %26 = vector.shape_cast %25 : vector<2xf32> to vector<2x1xf32>
    %c0_21 = arith.constant 0 : index
    %c0_22 = arith.constant 0 : index
    %27 = vector.load %arg9[%c0_21, %c0_22] : memref<1x1xf32, #tpu.memory_space<vmem>>, vector<1x1xf32>
    %28 = vector.broadcast %27 : vector<1x1xf32> to vector<2x1xf32>
    %29 = arith.addf %26, %28 : vector<2x1xf32>
    %c0_23 = arith.constant 0 : index
    %c0_24 = arith.constant 0 : index
    %30 = vector.load %arg10[%c0_23, %c0_24] : memref<2x1xf32, #tpu.memory_space<vmem>>, vector<2x1xf32>
    tpu.vector_store %arg10[%c0_23, %c0_24], %29 {strides = array<i32>} : memref<2x1xf32, #tpu.memory_space<vmem>>, vector<2x1xf32>,
    return
  }
  func.func @transform_0(%arg0: i32) -> (i32, i32) {
    %c0_i32 = arith.constant 0 : i32
    %c0_i32_0 = arith.constant 0 : i32
    return %arg0, %c0_i32 : i32, i32
  }
  func.func @transform_1(%arg0: i32) -> (i32, i32) {
    %c0_i32 = arith.constant 0 : i32
    %c0_i32_0 = arith.constant 0 : i32
    %c0_i32_1 = arith.constant 0 : i32
    return %c0_i32, %c0_i32_0 : i32, i32
  }
  func.func @transform_2(%arg0: i32) -> (i32, i32) {
    %c0_i32 = arith.constant 0 : i32
    %c0_i32_0 = arith.constant 0 : i32
    %c0_i32_1 = arith.constant 0 : i32
    return %c0_i32, %c0_i32_0 : i32, i32
  }
  func.func @transform_3(%arg0: i32) -> (i32, i32) {
    %c0_i32 = arith.constant 0 : i32
    %c0_i32_0 = arith.constant 0 : i32
    %c0_i32_1 = arith.constant 0 : i32
    return %c0_i32, %c0_i32_0 : i32, i32
  }
  func.func @transform_4(%arg0: i32) -> (i32, i32) {
    %c0_i32 = arith.constant 0 : i32
    %c0_i32_0 = arith.constant 0 : i32
    %c0_i32_1 = arith.constant 0 : i32
    return %c0_i32, %c0_i32_0 : i32, i32
  }
  func.func @transform_5(%arg0: i32) -> (i32, i32) {
    %c0_i32 = arith.constant 0 : i32
    %c0_i32_0 = arith.constant 0 : i32
    %c0_i32_1 = arith.constant 0 : i32
    return %c0_i32, %c0_i32_0 : i32, i32
  }
  func.func @transform_6(%arg0: i32) -> (i32, i32) {
    %c0_i32 = arith.constant 0 : i32
    %c0_i32_0 = arith.constant 0 : i32
    %c0_i32_1 = arith.constant 0 : i32
    return %c0_i32, %c0_i32_0 : i32, i32
  }
  func.func @transform_7(%arg0: i32) -> (i32, i32) {
    %c0_i32 = arith.constant 0 : i32
    %c0_i32_0 = arith.constant 0 : i32
    %c0_i32_1 = arith.constant 0 : i32
    return %c0_i32, %c0_i32_0 : i32, i32
  }
  func.func @transform_8(%arg0: i32) -> (i32, i32) {
    %c0_i32 = arith.constant 0 : i32
    %c0_i32_0 = arith.constant 0 : i32
    %c0_i32_1 = arith.constant 0 : i32
    return %c0_i32, %c0_i32_0 : i32, i32
  }
  func.func @transform_9(%arg0: i32) -> (i32, i32) {
    %c0_i32 = arith.constant 0 : i32
    %c0_i32_0 = arith.constant 0 : i32
    return %arg0, %c0_i32 : i32, i32
  }
}

</mosaic_0001>

<bundles_post_ra>
// kernel: tpu_custom_call.1
= control target key start
LH: loop header
LB: loop body
LE: loop exit
PB: predicated region body
PF: predicated region fallthrough
CT: control target
= control target key end

     0   :  { %s1562_s0 = inlined_call_operand.vmem [shape: f32[2,1024], index: 0, kind: input, shape index: {}]   ;;  %s1563_s1 = inlined_call_operand.hbm [shape: f32[1024,256], index: 1, kind: input, shape index: {}]   ;;  %s1564_s2 = inlined_call_operand.vmem [shape: f32[1,256], index: 2, kind: input, shape index: {}]   ;;  %s1565_s3 = inlined_call_operand.hbm [shape: f32[256,128], index: 3, kind: input, shape index: {}]   ;;  %s1566_s4 = inlined_call_operand.vmem [shape: f32[1,128], index: 4, kind: input, shape index: {}]   ;;  %s1567_s5 = inlined_call_operand.vmem [shape: f32[128,16], index: 5, kind: input, shape index: {}]   ;;  %s1568_s6 = inlined_call_operand.vmem [shape: f32[1,16], index: 6, kind: input, shape index: {}]   ;;  %s1569_s7 = inlined_call_operand.vmem [shape: f32[1,16], index: 7, kind: input, shape index: {}]   ;;  %s1570_s8 = inlined_call_operand.<no memory space> [shape: f32[1,1], index: 8, kind: input, shape index: {}]   ;;  %s1571_s9 = inlined_call_operand.vmem [shape: f32[2,1], index: 9, kind: output, shape index: {}]  }
   0x1   :  { %v14_v0 = vstv %s1570_s8 }
   0x2   :  { %15 = vst [vmem:[#allocation2] sm:$0x1] %v14_v0 }
   0x3   :  { %16 = vsyncpa [#allocation4], 0 }
   0x4   :  { %17 = vsyncpa [#allocation6], 0  ;;  %s1365_s11 = smov [#allocation3]   ;;  %s1317_s15 = scalar_lea.hbm %s1563_s1, 32768 }
   0x5   :  { %s25_s12 = sshll.u32 %s1365_s11, 4  ;;  %p1318_p0 = scmp.ne.s32.totalorder %s1563_s1, %s1317_s15  ;;  %s26_s12 = int_to_ptr.vmem [resolvable:$true] %s25_s12 }
   0x6   :  { %p1321_p1 = scmp.lt.u32.totalorder %s1317_s15, %s1563_s1 }
   0x8   :  { %p1323_p2 = pnand %p1321_p1, %p1318_p0 }
   0xa   :  { %1326 = shalt.err (!%p1323_p2)
}
   0xb   :  { %s1327_s8 = scalar_lea.vmem %s26_s12, 32768  ;;  %p1332_p4 = scmp.lt.s32.totalorder %s26_s12, %s26_s12 }
   0xc   :  { %p1328_p3 = scmp.ne.s32.totalorder %s26_s12, %s1327_s8  ;;  %p1333_p5 = scmp.lt.s32.totalorder %s1327_s8, %s1327_s8 }
   0xe   :  { %p1334_p6 = por %p1333_p5, %p1332_p4 }
  0x10   :  { %p1335_p7 = pnand %p1334_p6, %p1328_p3 }
  0x12   :  { %1338 = shalt.err (!%p1335_p7)
}
  0x13   :  { %s1366_s20 = smov 256   ;;  %s1367_s21 = smov 16  }
  0x14   :  { %31 = dma.hbm_to_vmem [thread:$0]  %s1563_s1, 32768, %s26_s12, [#allocation4], %s1366_s20, %s1366_s20, %s1367_s21  }
  0x15   :  { %s1368_s24 = smov [#allocation5]   ;;  %s1339_s28 = scalar_lea.hbm %s1565_s3, 4096 }
  0x16   :  { %s39_s25 = sshll.u32 %s1368_s24, 4  ;;  %p1340_p8 = scmp.ne.s32.totalorder %s1565_s3, %s1339_s28  ;;  %s40_s25 = int_to_ptr.vmem [resolvable:$true] %s39_s25 }
  0x17   :  { %p1343_p9 = scmp.lt.u32.totalorder %s1339_s28, %s1565_s3 }
  0x19   :  { %p1345_p10 = pnand %p1343_p9, %p1340_p8 }
  0x1b   :  { %1348 = shalt.err (!%p1345_p10)
}
  0x1c   :  { %s1349_s13 = scalar_lea.vmem %s40_s25, 4096  ;;  %p1354_p12 = scmp.lt.s32.totalorder %s40_s25, %s40_s25 }
  0x1d   :  { %p1350_p11 = scmp.ne.s32.totalorder %s40_s25, %s1349_s13  ;;  %p1355_p13 = scmp.lt.s32.totalorder %s1349_s13, %s1349_s13 }
  0x1f   :  { %p1356_p0 = por %p1355_p13, %p1354_p12 }
  0x21   :  { %p1357_p1 = pnand %p1356_p0, %p1350_p11 }
  0x23   :  { %1360 = shalt.err (!%p1357_p1)
}
  0x24   :  { %s1369_s1 = smov 128   ;;  %s1370_s12 = smov 8  }
  0x25   :  { %45 = dma.hbm_to_vmem [thread:$0]  %s1565_s3, 4096, %s40_s25, [#allocation6], %s1369_s1, %s1369_s1, %s1370_s12  }
  0x26   :  { %1361 = dma.done.wait [#allocation4], 32768  }
  0x27   :  { %1362 = vsyncadd [#allocation4], 4294934528 }
  0x28   :  { %1363 = dma.done.wait [#allocation6], 4096  }
  0x29   :  { %1364 = vsyncadd [#allocation6], 4294963200  ;;  %v129_v1 = vld [vmem:[#allocation3 + $0x208] sm:$0xff]  ;;  %v131_v2 = vld [vmem:[#allocation3 + $0x218] sm:$0xff]  ;;  %v322_v27 = vlaneseq  ;;  %v1371_v28 = vmov 1983009808  }
  0x2a   :  { %v128_v3 = vld [vmem:[#allocation3 + $0x200] sm:$0xff]  ;;  %v1049_v4 = vpack.c.bf16 %v131_v2, %v129_v1  ;;  %v130_v5 = vld [vmem:[#allocation3 + $0x210] sm:$0xff]  ;;  %v133_v6 = vld [vmem:[#allocation3 + $0x228] sm:$0xff]  ;;  %v336_v29 = vunpack.c.l.s4 %v1371_v28  ;;  %vm1373_vm0 = vmmov 0   ;;  %vm874_vm1 = vcmask 123904  }
  0x2b   :  { %v135_v7 = vld [vmem:[#allocation3 + $0x238] sm:$0xff]  ;;  %v1051_v8 = vpack.c.bf16 %v130_v5, %v128_v3  ;;  %v132_v10 = vld [vmem:[#allocation3 + $0x220] sm:$0xff]  ;;  %v134_v11 = vld [vmem:[#allocation3 + $0x230] sm:$0xff]  ;;  %v1452_v36 = vshrl.u32 %v322_v27, 7  ;;  %vm886_vm2 = vcmask 1024  }
  0x2c   :  { %v1053_v9 = vpack.c.bf16 %v135_v7, %v133_v6  ;;  %v137_v12 = vld [vmem:[#allocation3 + $0x248] sm:$0xff]  ;;  %1050 = vmatprep.subr.bf16.mxu0 %v1049_v4  ;;  %v139_v13 = vld [vmem:[#allocation3 + $0x258] sm:$0xff]  ;;  %v1055_v14 = vpack.c.bf16 %v134_v11, %v132_v10  ;;  %v136_v16 = vld [vmem:[#allocation3 + $0x240] sm:$0xff]  ;;  %v337_v37 = vunpack.c.0.s8 %v336_v29 }
  0x2d   :  { %1052 = vmatpush1.bf16.msra.mxu0 %v1051_v8  ;;  %v1057_v15 = vpack.c.bf16 %v139_v13, %v137_v12  ;;  %v138_v17 = vld [vmem:[#allocation3 + $0x250] sm:$0xff]  ;;  %v141_v18 = vld [vmem:[#allocation3 + $0x268] sm:$0xff]  ;;  %v143_v19 = vld [vmem:[#allocation3 + $0x278] sm:$0xff] }
  0x2e   :  { %1054 = vmatprep.subr.bf16.mxu0 %v1053_v9  ;;  %v1059_v20 = vpack.c.bf16 %v138_v17, %v136_v16  ;;  %v1061_v21 = vpack.c.bf16 %v143_v19, %v141_v18  ;;  %v140_v22 = vld [vmem:[#allocation3 + $0x260] sm:$0xff]  ;;  %v142_v23 = vld [vmem:[#allocation3 + $0x270] sm:$0xff]  ;;  %v145_v24 = vld [vmem:[#allocation3 + $0x288] sm:$0xff]  ;;  %v1455_v44 = vsub.s32 %v337_v37, %v1452_v36 }
  0x2f   :  { %v147_v25 = vld [vmem:[#allocation3 + $0x298] sm:$0xff]  ;;  %v1063_v26 = vpack.c.bf16 %v142_v23, %v140_v22  ;;  %v144_v31 = vld [vmem:[#allocation3 + $0x280] sm:$0xff]  ;;  %v146_v32 = vld [vmem:[#allocation3 + $0x290] sm:$0xff] }
  0x30   :  { %v1065_v30 = vpack.c.bf16 %v147_v25, %v145_v24  ;;  %v149_v33 = vld [vmem:[#allocation3 + $0x2a8] sm:$0xff]  ;;  %v151_v34 = vld [vmem:[#allocation3 + $0x2b8] sm:$0xff]  ;;  %v1067_v35 = vpack.c.bf16 %v146_v32, %v144_v31  ;;  %v148_v39 = vld [vmem:[#allocation3 + $0x2a0] sm:$0xff] }
  0x31   :  { %1056 = vmatpush1.bf16.msra.mxu0 %v1055_v14  ;;  %v1069_v38 = vpack.c.bf16 %v151_v34, %v149_v33  ;;  %v150_v40 = vld [vmem:[#allocation3 + $0x2b0] sm:$0xff]  ;;  %v153_v41 = vld [vmem:[#allocation3 + $0x2c8] sm:$0xff]  ;;  %v155_v42 = vld [vmem:[#allocation3 + $0x2d8] sm:$0xff] }
  0x32   :  { %1058 = vmatprep.subr.bf16.mxu0 %v1057_v15  ;;  %v1071_v43 = vpack.c.bf16 %v150_v40, %v148_v39  ;;  %v1073_v45 = vpack.c.bf16 %v155_v42, %v153_v41  ;;  %v152_v46 = vld [vmem:[#allocation3 + $0x2c0] sm:$0xff]  ;;  %v154_v47 = vld [vmem:[#allocation3 + $0x2d0] sm:$0xff]  ;;  %v157_v49 = vld [vmem:[#allocation3 + $0x2e8] sm:$0xff] }
  0x33   :  { %v1460_v48 = vld [vmem:[%s1562_s0] sm:$0xff]  ;;  %v1075_v52 = vpack.c.bf16 %v154_v47, %v152_v46  ;;  %v158_v56 = vld [vmem:[#allocation3 + $0x2f0] sm:$0xff]  ;;  %v161_v57 = vld [vmem:[#allocation3 + $0x308] sm:$0xff] }
  0x34   :  { %v159_v50 = vld [vmem:[#allocation3 + $0x2f8] sm:$0xff]  ;;  %v334_v51 = vcombine.high %v1460_v48, %v1460_v48  ;;  %v156_v55 = vld [vmem:[#allocation3 + $0x2e0] sm:$0xff]  ;;  %v162_v63 = vld [vmem:[#allocation3 + $0x310] sm:$0xff] }
  0x35   :  { %1060 = vmatpush1.bf16.msra.mxu0 %v1059_v20  ;;  %v1077_v54 = vpack.c.bf16 %v159_v50, %v157_v49  ;;  %v163_v58 = vld [vmem:[#allocation3 + $0x318] sm:$0xff]  ;;  %v1079_v60 = vpack.c.bf16 %v158_v56, %v156_v55  ;;  %v160_v62 = vld [vmem:[#allocation3 + $0x300] sm:$0xff]  ;;  %v165_v0 = vld [vmem:[#allocation3 + $0x328] sm:$0xff] }
  0x36   :  { %1062 = vmatprep.subr.bf16.mxu0 %v1061_v21  ;;  %v1465_v53 = vrot.slane %v334_v51, %v1455_v44  ;;  %v1081_v61 = vpack.c.bf16 %v163_v58, %v161_v57  ;;  %v167_v1 = vld [vmem:[#allocation3 + $0x338] sm:$0xff]  ;;  %v1083_v2 = vpack.c.bf16 %v162_v63, %v160_v62  ;;  %v164_v4 = vld [vmem:[#allocation3 + $0x320] sm:$0xff]  ;;  %v166_v5 = vld [vmem:[#allocation3 + $0x330] sm:$0xff] }
  0x37   :  { %v1085_v3 = vpack.c.bf16 %v167_v1, %v165_v0  ;;  %v169_v6 = vld [vmem:[#allocation3 + $0x348] sm:$0xff]  ;;  %v171_v7 = vld [vmem:[#allocation3 + $0x358] sm:$0xff]  ;;  %v1087_v8 = vpack.c.bf16 %v166_v5, %v164_v4  ;;  %v168_v10 = vld [vmem:[#allocation3 + $0x340] sm:$0xff] }
  0x38   :  { %v350_v59 = vcombine.high %v1465_v53, %v1465_v53  ;;  %v1089_v9 = vpack.c.bf16 %v171_v7, %v169_v6  ;;  %v170_v11 = vld [vmem:[#allocation3 + $0x350] sm:$0xff]  ;;  %v173_v12 = vld [vmem:[#allocation3 + $0x368] sm:$0xff]  ;;  %v175_v13 = vld [vmem:[#allocation3 + $0x378] sm:$0xff] }
  0x39   :  { %1064 = vmatpush1.bf16.msra.mxu0 %v1063_v26  ;;  %v1091_v14 = vpack.c.bf16 %v170_v11, %v168_v10  ;;  %v1093_v15 = vpack.c.bf16 %v175_v13, %v173_v12  ;;  %v172_v16 = vld [vmem:[#allocation3 + $0x360] sm:$0xff]  ;;  %v174_v17 = vld [vmem:[#allocation3 + $0x370] sm:$0xff]  ;;  %v177_v18 = vld [vmem:[#allocation3 + $0x388] sm:$0xff] }
  0x3a   :  { %1066 = vmatprep.subr.bf16.mxu0 %v1065_v30  ;;  %511 = vmatprep.mubr.f32.mxu0 %v350_v59  ;;  %v179_v19 = vld [vmem:[#allocation3 + $0x398] sm:$0xff]  ;;  %v65_v20 = vld [vmem:[#allocation3 + $0x8] sm:$0xff]  ;;  %v64_v23 = vld [vmem:[#allocation3] sm:$0xff]  ;;  %v1095_v24 = vpack.c.bf16 %v174_v17, %v172_v16  ;;  %v1476_v17 = vrot.slane %v1460_v48, %v1455_v44 }
  0x3b   :  { %v67_v21 = vld [vmem:[#allocation3 + $0x18] sm:$0xff]  ;;  %v176_v25 = vld [vmem:[#allocation3 + $0x380] sm:$0xff]  ;;  %v66_v26 = vld [vmem:[#allocation3 + $0x10] sm:$0xff]  ;;  %v1097_v27 = vpack.c.bf16 %v179_v19, %v177_v18 }
  0x3c   :  { %v985_v22 = vpack.c.bf16 %v67_v21, %v65_v20  ;;  %v178_v28 = vld [vmem:[#allocation3 + $0x390] sm:$0xff]  ;;  %v987_v29 = vpack.c.bf16 %v66_v26, %v64_v23  ;;  %v69_v30 = vld [vmem:[#allocation3 + $0x28] sm:$0xff]  ;;  %v71_v31 = vld [vmem:[#allocation3 + $0x38] sm:$0xff] }
  0x3d   :  { %1068 = vmatpush1.bf16.msra.mxu0 %v1067_v35  ;;  %v181_v32 = vld [vmem:[#allocation3 + $0x3a8] sm:$0xff]  ;;  %v183_v33 = vld [vmem:[#allocation3 + $0x3b8] sm:$0xff]  ;;  %v989_v34 = vpack.c.bf16 %v71_v31, %v69_v30  ;;  %v68_v35 = vld [vmem:[#allocation3 + $0x20] sm:$0xff] }
  0x3e   :  { %1070 = vmatprep.subr.bf16.mxu0 %v1069_v38  ;;  %986 = vmatprep.subr.bf16.mxu1 %v985_v22  ;;  %v70_v37 = vld [vmem:[#allocation3 + $0x30] sm:$0xff]  ;;  %v1099_v38 = vpack.c.bf16 %v178_v28, %v176_v25  ;;  %v180_v39 = vld [vmem:[#allocation3 + $0x3a0] sm:$0xff]  ;;  %v73_v41 = vld [vmem:[#allocation3 + $0x48] sm:$0xff] }
  0x3f   :  { %988 = vmatpush1.bf16.msra.mxu1 %v987_v29  ;;  %v991_v40 = vpack.c.bf16 %v70_v37, %v68_v35  ;;  %v75_v42 = vld [vmem:[#allocation3 + $0x58] sm:$0xff]  ;;  %v72_v47 = vld [vmem:[#allocation3 + $0x40] sm:$0xff]  ;;  %v74_v49 = vld [vmem:[#allocation3 + $0x50] sm:$0xff] }
  0x40   :  { %990 = vmatprep.subr.bf16.mxu1 %v989_v34  ;;  %v993_v46 = vpack.c.bf16 %v75_v42, %v73_v41  ;;  %v185_v50 = vld [vmem:[#allocation3 + $0x3c8] sm:$0xff]  ;;  %v187_v51 = vld [vmem:[#allocation3 + $0x3d8] sm:$0xff]  ;;  %v184_v57 = vld [vmem:[#allocation3 + $0x3c0] sm:$0xff] }
  0x41   :  { %1072 = vmatpush1.bf16.msra.mxu0 %v1071_v43  ;;  %v1101_v43 = vpack.c.bf16 %v183_v33, %v181_v32  ;;  %v79_v55 = vld [vmem:[#allocation3 + $0x78] sm:$0xff]  ;;  %v76_v59 = vld [vmem:[#allocation3 + $0x60] sm:$0xff]  ;;  %v186_v62 = vld [vmem:[#allocation3 + $0x3d0] sm:$0xff] }
  0x42   :  { %1074 = vmatprep.subr.bf16.mxu0 %v1073_v45  ;;  %v182_v45 = vld [vmem:[#allocation3 + $0x3b0] sm:$0xff]  ;;  %v81_v63 = vld [vmem:[#allocation3 + $0x88] sm:$0xff]  ;;  %v83_v0 = vld [vmem:[#allocation3 + $0x98] sm:$0xff]  ;;  %v1107_v5 = vpack.c.bf16 %v186_v62, %v184_v57 }
  0x43   :  { %992 = vmatpush1.bf16.msra.mxu1 %v991_v40  ;;  %v1103_v56 = vpack.c.bf16 %v182_v45, %v180_v39  ;;  %v189_v1 = vld [vmem:[#allocation3 + $0x3e8] sm:$0xff]  ;;  %v190_v6 = vld [vmem:[#allocation3 + $0x3f0] sm:$0xff]  ;;  %v1001_v7 = vpack.c.bf16 %v83_v0, %v81_v63  ;;  %v87_v13 = vld [vmem:[#allocation3 + $0xb8] sm:$0xff] }
  0x44   :  { %994 = vmatprep.subr.bf16.mxu1 %v993_v46  ;;  %v1472_v11 = vld [vmem:[%s1562_s0 + $0x8] sm:$0xff]  ;;  %v86_v22 = vld [vmem:[#allocation3 + $0xb0] sm:$0xff]  ;;  %v199_v48 = vld [vmem:[#allocation3 + $0x438] sm:$0xff] }
  0x45   :  { %1076 = vmatpush1.bf16.msra.mxu0 %v1075_v52  ;;  %v77_v52 = vld [vmem:[#allocation3 + $0x68] sm:$0xff]  ;;  %v1480_v19 = vrot.slane %v1472_v11, %v1455_v44  ;;  %v84_v21 = vld [vmem:[#allocation3 + $0xa0] sm:$0xff]  ;;  %v194_v25 = vld [vmem:[#allocation3 + $0x410] sm:$0xff] }
  0x46   :  { %1078 = vmatprep.subr.bf16.mxu0 %v1077_v54  ;;  %v995_v54 = vpack.c.bf16 %v74_v49, %v72_v47  ;;  %v997_v58 = vpack.c.bf16 %v79_v55, %v77_v52  ;;  %v85_v12 = vld [vmem:[#allocation3 + $0xa8] sm:$0xff]  ;;  %v91_v29 = vld [vmem:[#allocation3 + $0xd8] sm:$0xff]  ;;  %v1007_v30 = vpack.c.bf16 %v86_v22, %v84_v21  ;;  %v196_v32 = vld [vmem:[#allocation3 + $0x420] sm:$0xff] }
  0x47   :  { %v1005_v20 = vpack.c.bf16 %v87_v13, %v85_v12  ;;  %v197_v26 = vld [vmem:[#allocation3 + $0x428] sm:$0xff]  ;;  %v366_v33 = vcombine.high %v1480_v19, %v1480_v19  ;;  %v88_v34 = vld [vmem:[#allocation3 + $0xc0] sm:$0xff]  ;;  %v90_v35 = vld [vmem:[#allocation3 + $0xd0] sm:$0xff] }
  0x48   :  { %996 = vmatpush1.bf16.msra.mxu1 %v995_v54  ;;  %v89_v28 = vld [vmem:[#allocation3 + $0xc8] sm:$0xff]  ;;  %v1117_v37 = vpack.c.bf16 %v199_v48, %v197_v26  ;;  %v95_v41 = vld [vmem:[#allocation3 + $0xf8] sm:$0xff]  ;;  %v1011_v45 = vpack.c.bf16 %v90_v35, %v88_v34  ;;  %v200_v47 = vld [vmem:[#allocation3 + $0x440] sm:$0xff] }
  0x49   :  { %1080 = vmatpush1.bf16.msra.mxu0 %v1079_v60  ;;  %v78_v60 = vld [vmem:[#allocation3 + $0x70] sm:$0xff]  ;;  %998 = vmatprep.subr.bf16.mxu1 %v997_v58  ;;  %v1009_v39 = vpack.c.bf16 %v91_v29, %v89_v28  ;;  %v93_v40 = vld [vmem:[#allocation3 + $0xe8] sm:$0xff]  ;;  %v207_v58 = vld [vmem:[#allocation3 + $0x478] sm:$0xff] }
  0x4a   :  { %1082 = vmatprep.subr.bf16.mxu0 %v1081_v61  ;;  %v1105_v61 = vpack.c.bf16 %v187_v51, %v185_v50  ;;  %v999_v4 = vpack.c.bf16 %v78_v60, %v76_v59  ;;  %v201_v42 = vld [vmem:[#allocation3 + $0x448] sm:$0xff]  ;;  %v1013_v49 = vpack.c.bf16 %v95_v41, %v93_v40  ;;  %v92_v50 = vld [vmem:[#allocation3 + $0xe0] sm:$0xff]  ;;  %v94_v51 = vld [vmem:[#allocation3 + $0xf0] sm:$0xff] }
  0x4b   :  { %v202_v54 = vld [vmem:[#allocation3 + $0x450] sm:$0xff]  ;;  %v97_v55 = vld [vmem:[#allocation3 + $0x108] sm:$0xff]  ;;  %v1015_v59 = vpack.c.bf16 %v94_v51, %v92_v50  ;;  %v204_v60 = vld [vmem:[#allocation3 + $0x460] sm:$0xff] }
  0x4c   :  { %1000 = vmatpush1.bf16.msra.mxu1 %v999_v4  ;;  %v205_v57 = vld [vmem:[#allocation3 + $0x468] sm:$0xff]  ;;  %v96_v62 = vld [vmem:[#allocation3 + $0x100] sm:$0xff]  ;;  %v98_v63 = vld [vmem:[#allocation3 + $0x110] sm:$0xff] }
  0x4d   :  { %1084 = vmatpush1.bf16.msra.mxu0 %v1083_v2  ;;  %v191_v2 = vld [vmem:[#allocation3 + $0x3f8] sm:$0xff]  ;;  %1002 = vmatprep.subr.bf16.mxu1 %v1001_v7  ;;  %v1125_v0 = vpack.c.bf16 %v207_v58, %v205_v57  ;;  %v209_v4 = vld [vmem:[#allocation3 + $0x488] sm:$0xff]  ;;  %v102_v12 = vld [vmem:[#allocation3 + $0x130] sm:$0xff] }
  0x4e   :  { %1086 = vmatprep.subr.bf16.mxu0 %v1085_v3  ;;  %v188_v3 = vld [vmem:[#allocation3 + $0x3e0] sm:$0xff]  ;;  %v1109_v10 = vpack.c.bf16 %v191_v2, %v189_v1  ;;  %v206_v1 = vld [vmem:[#allocation3 + $0x470] sm:$0xff]  ;;  %v101_v2 = vld [vmem:[#allocation3 + $0x128] sm:$0xff] }
  0x4f   :  { %v1111_v18 = vpack.c.bf16 %v190_v6, %v188_v3  ;;  %v103_v3 = vld [vmem:[#allocation3 + $0x138] sm:$0xff]  ;;  %v1019_v6 = vpack.c.bf16 %v98_v63, %v96_v62  ;;  %v1127_v7 = vpack.c.bf16 %v206_v1, %v204_v60  ;;  %v106_v26 = vld [vmem:[#allocation3 + $0x150] sm:$0xff]  ;;  %v109_v28 = vld [vmem:[#allocation3 + $0x168] sm:$0xff] }
  0x50   :  { %v214_v48 = vld [vmem:[#allocation3 + $0x4b0] sm:$0xff]  ;;  %v111_v29 = vld [vmem:[#allocation3 + $0x178] sm:$0xff]  ;;  %v216_v34 = vld [vmem:[#allocation3 + $0x4c0] sm:$0xff] }
  0x51   :  { %1088 = vmatpush1.bf16.msra.mxu0 %v1087_v8  ;;  %v80_v8 = vld [vmem:[#allocation3 + $0x80] sm:$0xff]  ;;  %v1029_v35 = vpack.c.bf16 %v111_v29, %v109_v28  ;;  %v218_v40 = vld [vmem:[#allocation3 + $0x4d0] sm:$0xff]  ;;  %v113_v41 = vld [vmem:[#allocation3 + $0x188] sm:$0xff] }
  0x52   :  { %1090 = vmatprep.subr.bf16.mxu0 %v1089_v9  ;;  %v82_v9 = vld [vmem:[#allocation3 + $0x90] sm:$0xff]  ;;  %v112_v51 = vld [vmem:[#allocation3 + $0x180] sm:$0xff]  ;;  %v119_v57 = vld [vmem:[#allocation3 + $0x1b8] sm:$0xff] }
  0x53   :  { %v1003_v16 = vpack.c.bf16 %v82_v9, %v80_v8  ;;  %v208_v8 = vld [vmem:[#allocation3 + $0x480] sm:$0xff]  ;;  %v1021_v9 = vpack.c.bf16 %v103_v3, %v101_v2  ;;  %v225_v58 = vld [vmem:[#allocation3 + $0x508] sm:$0xff]  ;;  %v226_v2 = vld [vmem:[#allocation3 + $0x510] sm:$0xff] }
  0x54   :  { %v116_v63 = vld [vmem:[#allocation3 + $0x1a0] sm:$0xff]  ;;  %v121_v3 = vld [vmem:[#allocation3 + $0x1c8] sm:$0xff]  ;;  %v234_v28 = vld [vmem:[#allocation3 + $0x550] sm:$0xff] }
  0x55   :  { %1092 = vmatpush1.bf16.msra.mxu0 %v1091_v14  ;;  %v193_v14 = vld [vmem:[#allocation3 + $0x408] sm:$0xff]  ;;  %1004 = vmatpush1.bf16.msra.mxu1 %v1003_v16  ;;  %v107_v16 = vld [vmem:[#allocation3 + $0x158] sm:$0xff]  ;;  %v678_v29 = vld [vmem:[#allocation5 + $0x80] sm:$0xff] }
  0x56   :  { %1094 = vmatprep.subr.bf16.mxu0 %v1093_v15  ;;  %v195_v15 = vld [vmem:[#allocation3 + $0x418] sm:$0xff]  ;;  %1006 = vmatprep.subr.bf16.mxu1 %v1005_v20 }
  0x57   :  { %v1113_v23 = vpack.c.bf16 %v195_v15, %v193_v14  ;;  %v210_v14 = vld [vmem:[#allocation3 + $0x490] sm:$0xff]  ;;  %v105_v15 = vld [vmem:[#allocation3 + $0x148] sm:$0xff]  ;;  %v215_v20 = vld [vmem:[#allocation3 + $0x4b8] sm:$0xff] }
  0x58   :  { %v1131_v22 = vpack.c.bf16 %v210_v14, %v208_v8 }
  0x59   :  { %1096 = vmatpush1.bf16.msra.mxu0 %v1095_v24  ;;  %v192_v24 = vld [vmem:[#allocation3 + $0x400] sm:$0xff]  ;;  %1008 = vmatpush1.bf16.msra.mxu1 %v1007_v30  ;;  %v217_v30 = vld [vmem:[#allocation3 + $0x4c8] sm:$0xff] }
  0x5a   :  { %1098 = vmatprep.subr.bf16.mxu0 %v1097_v27  ;;  %v349_v27 = vcombine.high %v1476_v17, %v1476_v17  ;;  %v1115_v31 = vpack.c.bf16 %v194_v25, %v192_v24  ;;  %1010 = vmatprep.subr.bf16.mxu1 %v1009_v39  ;;  %v1025_v24 = vpack.c.bf16 %v107_v16, %v105_v15  ;;  %v104_v25 = vld [vmem:[#allocation3 + $0x140] sm:$0xff]  ;;  %v230_v15 = vld [vmem:[#allocation3 + $0x530] sm:$0xff]  ;;  %v125_v16 = vld [vmem:[#allocation3 + $0x1e8] sm:$0xff] }
  0x5c   :  { %440 = vmatprep.mubr.f32.mxu1 %v349_v27 }
  0x5d   :  { %1100 = vmatpush1.bf16.msra.mxu0 %v1099_v38  ;;  %v198_v38 = vld [vmem:[#allocation3 + $0x430] sm:$0xff]  ;;  %1012 = vmatpush1.bf16.msra.mxu1 %v1011_v45  ;;  %v223_v45 = vld [vmem:[#allocation3 + $0x4f8] sm:$0xff] }
  0x5e   :  { %1102 = vmatprep.subr.bf16.mxu0 %v1101_v43  ;;  %v203_v43 = vld [vmem:[#allocation3 + $0x458] sm:$0xff]  ;;  %v1119_v46 = vpack.c.bf16 %v198_v38, %v196_v32  ;;  %1014 = vmatprep.subr.bf16.mxu1 %v1013_v49  ;;  %v1027_v32 = vpack.c.bf16 %v106_v26, %v104_v25  ;;  %v110_v38 = vld [vmem:[#allocation3 + $0x170] sm:$0xff]  ;;  %v220_v49 = vld [vmem:[#allocation3 + $0x4e0] sm:$0xff] }
  0x5f   :  { %v1121_v52 = vpack.c.bf16 %v203_v43, %v201_v42  ;;  %v115_v42 = vld [vmem:[#allocation3 + $0x198] sm:$0xff]  ;;  %v221_v43 = vld [vmem:[#allocation3 + $0x4e8] sm:$0xff]  ;;  %v124_v26 = vld [vmem:[#allocation3 + $0x1e0] sm:$0xff] }
  0x60   :  { %v1033_v50 = vpack.c.bf16 %v115_v42, %v113_v41  ;;  %v238_v41 = vld [vmem:[#allocation3 + $0x570] sm:$0xff] }
  0x61   :  { %1104 = vmatpush1.bf16.msra.mxu0 %v1103_v56  ;;  %v99_v56 = vld [vmem:[#allocation3 + $0x118] sm:$0xff]  ;;  %1016 = vmatpush1.bf16.msra.mxu1 %v1015_v59  ;;  %v680_v42 = vld [vmem:[#allocation5 + $0x90] sm:$0xff] }
  0x62   :  { %1106 = vmatprep.subr.bf16.mxu0 %v1105_v61  ;;  %v1017_v61 = vpack.c.bf16 %v99_v56, %v97_v55  ;;  %v222_v55 = vld [vmem:[#allocation3 + $0x4f0] sm:$0xff]  ;;  %v117_v56 = vld [vmem:[#allocation3 + $0x1a8] sm:$0xff]  ;;  %v227_v59 = vld [vmem:[#allocation3 + $0x518] sm:$0xff] }
  0x63   :  { %v1143_v60 = vpack.c.bf16 %v222_v55, %v220_v49  ;;  %v1037_v62 = vpack.c.bf16 %v119_v57, %v117_v56  ;;  %v1145_v1 = vpack.c.bf16 %v227_v59, %v225_v58  ;;  %v242_v56 = vld [vmem:[#allocation3 + $0x590] sm:$0xff]  ;;  %v682_v57 = vld [vmem:[#allocation5 + $0xa0] sm:$0xff]  ;;  %v683_v58 = vld [vmem:[#allocation5 + $0xa8] sm:$0xff] }
  0x64   :  { %1018 = vmatprep.subr.bf16.mxu1 %v1017_v61  ;;  %v224_v61 = vld [vmem:[#allocation3 + $0x500] sm:$0xff]  ;;  %v245_v59 = vld [vmem:[#allocation3 + $0x5a8] sm:$0xff] }
  0x65   :  { %1108 = vmatpush1.bf16.msra.mxu0 %v1107_v5  ;;  %v211_v5 = vld [vmem:[#allocation3 + $0x498] sm:$0xff]  ;;  %1020 = vmatpush1.bf16.msra.mxu1 %v1019_v6  ;;  %v1147_v8 = vpack.c.bf16 %v226_v2, %v224_v61 }
  0x66   :  { %1110 = vmatprep.subr.bf16.mxu0 %v1109_v10  ;;  %v100_v10 = vld [vmem:[#allocation3 + $0x120] sm:$0xff]  ;;  %v1129_v13 = vpack.c.bf16 %v211_v5, %v209_v4  ;;  %1022 = vmatprep.subr.bf16.mxu1 %v1021_v9  ;;  %v123_v4 = vld [vmem:[#allocation3 + $0x1d8] sm:$0xff]  ;;  %v229_v5 = vld [vmem:[#allocation3 + $0x528] sm:$0xff] }
  0x67   :  { %v1023_v21 = vpack.c.bf16 %v102_v12, %v100_v10  ;;  %v231_v6 = vld [vmem:[#allocation3 + $0x538] sm:$0xff]  ;;  %v228_v9 = vld [vmem:[#allocation3 + $0x520] sm:$0xff]  ;;  %v1041_v10 = vpack.c.bf16 %v123_v4, %v121_v3  ;;  %v246_v3 = vld [vmem:[#allocation3 + $0x5b0] sm:$0xff] }
  0x68   :  { %v120_v12 = vld [vmem:[#allocation3 + $0x1c0] sm:$0xff]  ;;  %v1149_v14 = vpack.c.bf16 %v231_v6, %v229_v5  ;;  %v684_v4 = vld [vmem:[#allocation5 + $0xb0] sm:$0xff]  ;;  %v685_v5 = vld [vmem:[#allocation5 + $0xb8] sm:$0xff] }
  0x69   :  { %1112 = vmatpush1.bf16.msra.mxu0 %v1111_v18  ;;  %v213_v18 = vld [vmem:[#allocation3 + $0x4a8] sm:$0xff]  ;;  %1024 = vmatpush1.bf16.msra.mxu1 %v1023_v21  ;;  %v235_v21 = vld [vmem:[#allocation3 + $0x558] sm:$0xff] }
  0x6a   :  { %1114 = vmatprep.subr.bf16.mxu0 %v1113_v23  ;;  %v212_v23 = vld [vmem:[#allocation3 + $0x4a0] sm:$0xff]  ;;  %v1133_v27 = vpack.c.bf16 %v215_v20, %v213_v18  ;;  %1026 = vmatprep.subr.bf16.mxu1 %v1025_v24  ;;  %v127_v18 = vld [vmem:[#allocation3 + $0x1f8] sm:$0xff]  ;;  %v233_v20 = vld [vmem:[#allocation3 + $0x548] sm:$0xff] }
  0x6b   :  { %v232_v24 = vld [vmem:[#allocation3 + $0x540] sm:$0xff]  ;;  %v1045_v25 = vpack.c.bf16 %v127_v18, %v125_v16  ;;  %v249_v6 = vld [vmem:[#allocation3 + $0x5c8] sm:$0xff] }
  0x6c   :  { %512 = vmatmul.mubr.f32.vlgmr.msra.gmra.mrb[0].mxu0 %v1465_v53  ;;  %v1123_v53 = vpack.c.bf16 %v202_v54, %v200_v47  ;;  %v1139_v47 = vpack.c.bf16 %v218_v40, %v216_v34  ;;  %v1141_v54 = vpack.c.bf16 %v223_v45, %v221_v43  ;;  %v1155_v34 = vpack.c.bf16 %v234_v28, %v232_v24  ;;  %v681_v43 = vld [vmem:[#allocation5 + $0x98] sm:$0xff]  ;;  %v241_v45 = vld [vmem:[#allocation3 + $0x588] sm:$0xff]  ;;  %v686_v16 = vld [vmem:[#allocation5 + $0xc0] sm:$0xff] }
  0x6d   :  { %1116 = vmatpush1.bf16.msra.mxu0 %v1115_v31  ;;  %582 = vmatprep.mubr.f32.mxu0 %v366_v33  ;;  %v219_v31 = vld [vmem:[#allocation3 + $0x4d8] sm:$0xff]  ;;  %v1135_v33 = vpack.c.bf16 %v214_v48, %v212_v23  ;;  %v1151_v23 = vpack.c.bf16 %v230_v15, %v228_v9  ;;  %v1153_v48 = vpack.c.bf16 %v235_v21, %v233_v20  ;;  %v248_v9 = vld [vmem:[#allocation3 + $0x5c0] sm:$0xff]  ;;  %v250_v15 = vld [vmem:[#allocation3 + $0x5d0] sm:$0xff] }
  0x6e   :  { %1118 = vmatprep.subr.bf16.mxu0 %v1117_v37  ;;  %v108_v37 = vld [vmem:[#allocation3 + $0x160] sm:$0xff]  ;;  %v1137_v39 = vpack.c.bf16 %v219_v31, %v217_v30  ;;  %1028 = vmatpush1.bf16.msra.mxu1 %v1027_v32  ;;  %v679_v30 = vld [vmem:[#allocation5 + $0x88] sm:$0xff]  ;;  %v239_v32 = vld [vmem:[#allocation3 + $0x578] sm:$0xff] }
  0x6f   :  { %1030 = vmatprep.subr.bf16.mxu1 %v1029_v35  ;;  %v237_v31 = vld [vmem:[#allocation3 + $0x568] sm:$0xff]  ;;  %v236_v35 = vld [vmem:[#allocation3 + $0x560] sm:$0xff]  ;;  %v255_v21 = vld [vmem:[#allocation3 + $0x5f8] sm:$0xff] }
  0x70   :  { %v1157_v40 = vpack.c.bf16 %v239_v32, %v237_v31  ;;  %v1159_v49 = vpack.c.bf16 %v238_v41, %v236_v35  ;;  %v687_v18 = vld [vmem:[#allocation5 + $0xc8] sm:$0xff]  ;;  %v252_v24 = vld [vmem:[#allocation3 + $0x5e0] sm:$0xff]  ;;  %v689_v31 = vld [vmem:[#allocation5 + $0xd8] sm:$0xff] }
  0x71   :  { %1120 = vmatpush1.bf16.msra.mxu0 %v1119_v46  ;;  %v1031_v46 = vpack.c.bf16 %v110_v38, %v108_v37  ;;  %v1241_v37 = vpack.c.bf16 %v679_v30, %v678_v29  ;;  %v662_v38 = vld [vmem:[#allocation5] sm:$0xff]  ;;  %v253_v20 = vld [vmem:[#allocation3 + $0x5e8] sm:$0xff]  ;;  %v254_v29 = vld [vmem:[#allocation3 + $0x5f0] sm:$0xff] }
  0x72   :  { %1122 = vmatprep.subr.bf16.mxu0 %v1121_v52  ;;  %v114_v52 = vld [vmem:[#allocation3 + $0x190] sm:$0xff]  ;;  %v1173_v28 = vpack.c.bf16 %v255_v21, %v253_v20  ;;  %v257_v32 = vld [vmem:[#allocation3 + $0x608] sm:$0xff]  ;;  %v1175_v35 = vpack.c.bf16 %v254_v29, %v252_v24  ;;  %v256_v41 = vld [vmem:[#allocation3 + $0x600] sm:$0xff] }
  0x73   :  { %1032 = vmatpush1.bf16.msra.mxu1 %v1031_v46  ;;  %v243_v46 = vld [vmem:[#allocation3 + $0x598] sm:$0xff]  ;;  %v688_v30 = vld [vmem:[#allocation5 + $0xd0] sm:$0xff] }
  0x74   :  { %1034 = vmatprep.subr.bf16.mxu1 %v1033_v50  ;;  %v240_v50 = vld [vmem:[#allocation3 + $0x580] sm:$0xff]  ;;  %v1161_v55 = vpack.c.bf16 %v243_v46, %v241_v45  ;;  %v263_v45 = vld [vmem:[#allocation3 + $0x638] sm:$0xff]  ;;  %v286_v24 = vld [vmem:[#allocation3 + $0x6f0] sm:$0xff] }
  0x75   :  { %1124 = vmatpush1.bf16.msra.mxu0 %v1123_v53  ;;  %v1035_v53 = vpack.c.bf16 %v114_v52, %v112_v51  ;;  %v1245_v51 = vpack.c.bf16 %v681_v43, %v680_v42  ;;  %v664_v52 = vld [vmem:[#allocation5 + $0x10] sm:$0xff]  ;;  %v1163_v61 = vpack.c.bf16 %v242_v56, %v240_v50  ;;  %v261_v43 = vld [vmem:[#allocation3 + $0x628] sm:$0xff]  ;;  %v260_v50 = vld [vmem:[#allocation3 + $0x620] sm:$0xff] }
  0x76   :  { %1126 = vmatprep.subr.bf16.mxu0 %v1125_v0  ;;  %v118_v0 = vld [vmem:[#allocation3 + $0x1b0] sm:$0xff]  ;;  %v287_v20 = vld [vmem:[#allocation3 + $0x6f8] sm:$0xff] }
  0x77   :  { %1036 = vmatpush1.bf16.msra.mxu1 %v1035_v53  ;;  %v247_v53 = vld [vmem:[#allocation3 + $0x5b8] sm:$0xff]  ;;  %v258_v42 = vld [vmem:[#allocation3 + $0x610] sm:$0xff] }
  0x78   :  { %1038 = vmatprep.subr.bf16.mxu1 %v1037_v62  ;;  %v244_v62 = vld [vmem:[#allocation3 + $0x5a0] sm:$0xff]  ;;  %v1165_v2 = vpack.c.bf16 %v247_v53, %v245_v59  ;;  %v269_v59 = vld [vmem:[#allocation3 + $0x668] sm:$0xff]  ;;  %v271_v53 = vld [vmem:[#allocation3 + $0x678] sm:$0xff] }
  0x79   :  { %1128 = vmatpush1.bf16.msra.mxu0 %v1127_v7  ;;  %v1039_v7 = vpack.c.bf16 %v118_v0, %v116_v63  ;;  %v1249_v63 = vpack.c.bf16 %v683_v58, %v682_v57  ;;  %v666_v0 = vld [vmem:[#allocation5 + $0x20] sm:$0xff]  ;;  %v266_v58 = vld [vmem:[#allocation3 + $0x650] sm:$0xff] }
  0x7a   :  { %1130 = vmatprep.subr.bf16.mxu0 %v1129_v13  ;;  %v122_v13 = vld [vmem:[#allocation3 + $0x1d0] sm:$0xff]  ;;  %v264_v57 = vld [vmem:[#allocation3 + $0x640] sm:$0xff] }
  0x7b   :  { %1040 = vmatpush1.bf16.msra.mxu1 %v1039_v7  ;;  %v251_v7 = vld [vmem:[#allocation3 + $0x5d8] sm:$0xff]  ;;  %v290_v29 = vld [vmem:[#allocation3 + $0x710] sm:$0xff] }
  0x7c   :  { %1042 = vmatprep.subr.bf16.mxu1 %v1041_v10  ;;  %v1253_v10 = vpack.c.bf16 %v685_v5, %v684_v4  ;;  %v274_v4 = vld [vmem:[#allocation3 + $0x690] sm:$0xff]  ;;  %v277_v5 = vld [vmem:[#allocation3 + $0x6a8] sm:$0xff] }
  0x7d   :  { %1132 = vmatpush1.bf16.msra.mxu0 %v1131_v22  ;;  %v1043_v22 = vpack.c.bf16 %v122_v13, %v120_v12  ;;  %v668_v12 = vld [vmem:[#allocation5 + $0x30] sm:$0xff]  ;;  %v669_v13 = vld [vmem:[#allocation5 + $0x38] sm:$0xff] }
  0x7e   :  { %1134 = vmatprep.subr.bf16.mxu0 %v1133_v27  ;;  %v126_v27 = vld [vmem:[#allocation3 + $0x1f0] sm:$0xff] }
  0x7f   :  { %1044 = vmatpush1.bf16.msra.mxu1 %v1043_v22  ;;  %v1255_v22 = vpack.c.bf16 %v669_v13, %v668_v12  ;;  %v283_v12 = vld [vmem:[#allocation3 + $0x6d8] sm:$0xff] }
  0x80   :  { %1046 = vmatprep.subr.bf16.mxu1 %v1045_v25  ;;  %v351_v25 = vcombine.high %v1472_v11, %v1472_v11  ;;  %v1261_v11 = vpack.c.bf16 %v689_v31, %v688_v30  ;;  %v293_v30 = vld [vmem:[#allocation3 + $0x728] sm:$0xff]  ;;  %v295_v31 = vld [vmem:[#allocation3 + $0x738] sm:$0xff] }
  0x81   :  { %1136 = vmatpush1.bf16.msra.mxu0 %v1135_v33  ;;  %v1047_v33 = vpack.c.bf16 %v126_v27, %v124_v26  ;;  %v1257_v26 = vpack.c.bf16 %v687_v18, %v686_v16  ;;  %v670_v27 = vld [vmem:[#allocation5 + $0x40] sm:$0xff]  ;;  %v282_v16 = vld [vmem:[#allocation3 + $0x6d0] sm:$0xff]  ;;  %v285_v18 = vld [vmem:[#allocation3 + $0x6e8] sm:$0xff] }
  0x82   :  { %1138 = vmatprep.subr.bf16.mxu0 %v1137_v39  ;;  %v663_v39 = vld [vmem:[#allocation5 + $0x8] sm:$0xff] }
  0x83   :  { %1048 = vmatpush1.bf16.msra.mxu1 %v1047_v33  ;;  %v259_v33 = vld [vmem:[#allocation3 + $0x618] sm:$0xff] }
  0x84   :  { %1242 = vmatprep.subr.bf16.mxu1 %v1241_v37  ;;  %v1491_v37 = vrot.slane %v351_v25, %v1455_v44  ;;  %v1181_v44 = vpack.c.bf16 %v263_v45, %v261_v43  ;;  %v289_v25 = vld [vmem:[#allocation3 + $0x708] sm:$0xff]  ;;  %v303_v45 = vld [vmem:[#allocation3 + $0x778] sm:$0xff] }
  0x85   :  { %1140 = vmatpush1.bf16.msra.mxu0 %v1139_v47  ;;  %v1243_v47 = vpack.c.bf16 %v663_v39, %v662_v38  ;;  %v672_v38 = vld [vmem:[#allocation5 + $0x50] sm:$0xff]  ;;  %v673_v39 = vld [vmem:[#allocation5 + $0x58] sm:$0xff]  ;;  %v301_v43 = vld [vmem:[#allocation3 + $0x768] sm:$0xff] }
  0x86   :  { %1142 = vmatprep.subr.bf16.mxu0 %v1141_v54  ;;  %v665_v54 = vld [vmem:[#allocation5 + $0x18] sm:$0xff]  ;;  %441 = vmatmul.mubr.f32.vlgmr.msra.gmra.mrb[0].mxu1 %v1476_v17  ;;  %v1167_v17 = vpack.c.bf16 %v246_v3, %v244_v62  ;;  %v1263_v46 = vpack.c.bf16 %v673_v39, %v672_v38  ;;  %v268_v62 = vld [vmem:[#allocation3 + $0x660] sm:$0xff] }
  0x87   :  { %1244 = vmatpush3.bf16.msra.mxu1 %v1243_v47  ;;  %v1179_v47 = vpack.c.bf16 %v258_v42, %v256_v41  ;;  %v272_v3 = vld [vmem:[#allocation3 + $0x680] sm:$0xff]  ;;  %v299_v38 = vld [vmem:[#allocation3 + $0x758] sm:$0xff]  ;;  %v298_v42 = vld [vmem:[#allocation3 + $0x750] sm:$0xff] }
  0x88   :  { %1246 = vmatprep.subr.bf16.mxu1 %v1245_v51  ;;  %v262_v51 = vld [vmem:[#allocation3 + $0x630] sm:$0xff]  ;;  %v296_v41 = vld [vmem:[#allocation3 + $0x740] sm:$0xff] }
  0x89   :  { %1144 = vmatpush1.bf16.msra.mxu0 %v1143_v60  ;;  %v1247_v60 = vpack.c.bf16 %v665_v54, %v664_v52  ;;  %v265_v52 = vld [vmem:[#allocation3 + $0x648] sm:$0xff]  ;;  %v267_v54 = vld [vmem:[#allocation3 + $0x658] sm:$0xff] }
  0x8a   :  { %1146 = vmatprep.subr.bf16.mxu0 %v1145_v1  ;;  %v667_v1 = vld [vmem:[#allocation5 + $0x28] sm:$0xff]  ;;  %v1185_v56 = vpack.c.bf16 %v267_v54, %v265_v52 }
  0x8b   :  { %1248 = vmatpush3.bf16.msra.mxu1 %v1247_v60  ;;  %v1187_v60 = vpack.c.bf16 %v266_v58, %v264_v57  ;;  %v309_v57 = vld [vmem:[#allocation3 + $0x7a8] sm:$0xff]  ;;  %v311_v58 = vld [vmem:[#allocation3 + $0x7b8] sm:$0xff] }
  0x8c   :  { %1250 = vmatprep.subr.bf16.mxu1 %v1249_v63  ;;  %v270_v63 = vld [vmem:[#allocation3 + $0x670] sm:$0xff] }
  0x8d   :  { %1148 = vmatpush1.bf16.msra.mxu0 %v1147_v8  ;;  %v1251_v8 = vpack.c.bf16 %v667_v1, %v666_v0  ;;  %v273_v0 = vld [vmem:[#allocation3 + $0x688] sm:$0xff]  ;;  %v275_v1 = vld [vmem:[#allocation3 + $0x698] sm:$0xff] }
  0x8e   :  { %1150 = vmatprep.subr.bf16.mxu0 %v1149_v14  ;;  %v1169_v14 = vpack.c.bf16 %v251_v7, %v249_v6  ;;  %v279_v6 = vld [vmem:[#allocation3 + $0x6b8] sm:$0xff]  ;;  %v1195_v7 = vpack.c.bf16 %v274_v4, %v272_v3  ;;  %v317_v3 = vld [vmem:[#allocation3 + $0x7e8] sm:$0xff] }
  0x8f   :  { %1252 = vmatpush3.bf16.msra.mxu1 %v1251_v8  ;;  %v1197_v8 = vpack.c.bf16 %v279_v6, %v277_v5  ;;  %v319_v4 = vld [vmem:[#allocation3 + $0x7f8] sm:$0xff] }
  0x90   :  { %1254 = vmatprep.subr.bf16.mxu1 %v1253_v10  ;;  %v281_v10 = vld [vmem:[#allocation3 + $0x6c8] sm:$0xff]  ;;  %v1237_v6 = vpack.c.bf16 %v319_v4, %v317_v3 }
  0x91   :  { %1152 = vmatpush1.bf16.msra.mxu0 %v1151_v23  ;;  %v1171_v23 = vpack.c.bf16 %v250_v15, %v248_v9  ;;  %v278_v9 = vld [vmem:[#allocation3 + $0x6b0] sm:$0xff]  ;;  %v280_v15 = vld [vmem:[#allocation3 + $0x6c0] sm:$0xff] }
  0x92   :  { %1154 = vmatprep.subr.bf16.mxu0 %v1153_v48  ;;  %v671_v48 = vld [vmem:[#allocation5 + $0x48] sm:$0xff]  ;;  %v1203_v21 = vpack.c.bf16 %v282_v16, %v280_v15  ;;  %v692_v16 = vld [vmem:[#allocation5 + $0xf0] sm:$0xff] }
  0x93   :  { %1256 = vmatpush3.bf16.msra.mxu1 %v1255_v22  ;;  %v1205_v22 = vpack.c.bf16 %v287_v20, %v285_v18  ;;  %v693_v18 = vld [vmem:[#allocation5 + $0xf8] sm:$0xff] }
  0x94   :  { %1258 = vmatprep.subr.bf16.mxu1 %v1257_v26  ;;  %v291_v26 = vld [vmem:[#allocation3 + $0x718] sm:$0xff]  ;;  %v1269_v20 = vpack.c.bf16 %v693_v18, %v692_v16 }
  0x95   :  { %1156 = vmatpush1.bf16.msra.mxu0 %v1155_v34  ;;  %v1259_v34 = vpack.c.bf16 %v671_v48, %v670_v27  ;;  %v1209_v48 = vpack.c.bf16 %v291_v26, %v289_v25  ;;  %v324_v26 = vsub.s32 0, %v1452_v36 }
  0x96   :  { %1158 = vmatprep.subr.bf16.mxu0 %v1157_v40  ;;  %v1177_v40 = vpack.c.bf16 %v259_v33, %v257_v32  ;;  %v1213_v33 = vpack.c.bf16 %v295_v31, %v293_v30 }
  0x97   :  { %1260 = vmatpush3.bf16.msra.mxu1 %v1259_v34  ;;  %v292_v34 = vld [vmem:[#allocation3 + $0x720] sm:$0xff] }
  0x98   :  { %1262 = vmatprep.subr.bf16.mxu1 %v1261_v11  ;;  %v297_v11 = vld [vmem:[#allocation3 + $0x748] sm:$0xff] }
  0x99   :  { %1160 = vmatpush1.bf16.msra.mxu0 %v1159_v49  ;;  %v367_v49 = vcombine.high %v1491_v37, %v1491_v37 }
  0x9a   :  { %1162 = vmatprep.subr.bf16.mxu0 %v1161_v55  ;;  %v1183_v55 = vpack.c.bf16 %v262_v51, %v260_v50  ;;  %v305_v50 = vld [vmem:[#allocation3 + $0x788] sm:$0xff]  ;;  %v307_v51 = vld [vmem:[#allocation3 + $0x798] sm:$0xff] }
  0x9b   :  { %1264 = vmatpush3.bf16.msra.mxu1 %v1263_v46  ;;  %v1219_v46 = vpack.c.bf16 %v298_v42, %v296_v41  ;;  %v1225_v54 = vpack.c.bf16 %v307_v51, %v305_v50  ;;  %v775_v42 = vld [vmem:[%s1567_s5 + $0x18] sm:$0xff]  ;;  %v780_v51 = vld [vmem:[%s1567_s5 + $0x40] sm:$0xff] }
  0x9d   :  { %1164 = vmatpush1.bf16.msra.mxu0 %v1163_v61  ;;  %v1189_v61 = vpack.c.bf16 %v271_v53, %v269_v59  ;;  %v1229_v53 = vpack.c.bf16 %v311_v58, %v309_v57  ;;  %v784_v58 = vld [vmem:[%s1567_s5 + $0x60] sm:$0xff] }
  0x9e   :  { %1166 = vmatprep.subr.bf16.mxu0 %v1165_v2  ;;  %v1193_v2 = vpack.c.bf16 %v275_v1, %v273_v0 }
  0xa1   :  { %1168 = vmatpush1.bf16.msra.mxu0 %v1167_v17  ;;  %v276_v17 = vld [vmem:[#allocation3 + $0x6a0] sm:$0xff] }
  0xa2   :  { %1170 = vmatprep.subr.bf16.mxu0 %v1169_v14  ;;  %v1199_v13 = vpack.c.bf16 %v278_v9, %v276_v17  ;;  %v1201_v14 = vpack.c.bf16 %v283_v12, %v281_v10  ;;  %v690_v9 = vld [vmem:[#allocation5 + $0xe0] sm:$0xff]  ;;  %v691_v10 = vld [vmem:[#allocation5 + $0xe8] sm:$0xff] }
  0xa3   :  { %v1265_v12 = vpack.c.bf16 %v691_v10, %v690_v9 }
  0xa5   :  { %1172 = vmatpush1.bf16.msra.mxu0 %v1171_v23  ;;  %v284_v23 = vld [vmem:[#allocation3 + $0x6e0] sm:$0xff]  ;;  %1266 = vmatprep.subr.bf16.mxu1 %v1265_v12 }
  0xa6   :  { %1174 = vmatprep.subr.bf16.mxu0 %v1173_v28  ;;  %v1207_v27 = vpack.c.bf16 %v286_v24, %v284_v23  ;;  %v288_v28 = vld [vmem:[#allocation3 + $0x700] sm:$0xff]  ;;  %v1372_v24 = vmov 0.0|0.0  }
  0xa7   :  { %v1211_v32 = vpack.c.bf16 %v290_v29, %v288_v28 }
  0xa9   :  { %1176 = vmatpush1.bf16.msra.mxu0 %v1175_v35  ;;  %v294_v35 = vld [vmem:[#allocation3 + $0x730] sm:$0xff] }
  0xaa   :  { %1178 = vmatprep.subr.bf16.mxu0 %v1177_v40  ;;  %v1215_v39 = vpack.c.bf16 %v294_v35, %v292_v34  ;;  %v1217_v40 = vpack.c.bf16 %v299_v38, %v297_v11  ;;  %v772_v35 = vld [vmem:[%s1567_s5] sm:$0xff]  ;;  %v773_v11 = vld [vmem:[%s1567_s5 + $0x8] sm:$0xff] }
  0xac   :  { %583 = vmatmul.mubr.f32.vlgmr.msra.gmra.mrb[0].mxu0 %v1480_v19  ;;  %v1191_v19 = vpack.c.bf16 %v270_v63, %v268_v62  ;;  %v313_v62 = vld [vmem:[#allocation3 + $0x7c8] sm:$0xff]  ;;  %v315_v63 = vld [vmem:[#allocation3 + $0x7d8] sm:$0xff] }
  0xad   :  { %1180 = vmatpush1.bf16.msra.mxu0 %v1179_v47  ;;  %653 = vmatprep.mubr.f32.mxu0 %v367_v49  ;;  %v1221_v47 = vpack.c.bf16 %v303_v45, %v301_v43  ;;  %v300_v49 = vld [vmem:[#allocation3 + $0x760] sm:$0xff]  ;;  %v1233_v1 = vpack.c.bf16 %v315_v63, %v313_v62  ;;  %v1374_v63 = vmov 0.0  }
  0xae   :  { %1182 = vmatprep.subr.bf16.mxu0 %v1181_v44  ;;  %v302_v44 = vld [vmem:[#allocation3 + $0x770] sm:$0xff]  ;;  %v776_v45 = vld [vmem:[%s1567_s5 + $0x20] sm:$0xff] }
  0xaf   :  { %v1223_v52 = vpack.c.bf16 %v302_v44, %v300_v49  ;;  %v778_v49 = vld [vmem:[%s1567_s5 + $0x30] sm:$0xff]  ;;  %v779_v44 = vld [vmem:[%s1567_s5 + $0x38] sm:$0xff] }
  0xb0   :  { %v1283_v50 = vpack.c.bf16 %v779_v44, %v778_v49 }
  0xb1   :  { %1184 = vmatpush1.bf16.msra.mxu0 %v1183_v55  ;;  %v304_v55 = vld [vmem:[#allocation3 + $0x780] sm:$0xff] }
  0xb2   :  { %1186 = vmatprep.subr.bf16.mxu0 %v1185_v56  ;;  %v306_v56 = vld [vmem:[#allocation3 + $0x790] sm:$0xff] }
  0xb3   :  { %v1227_v59 = vpack.c.bf16 %v306_v56, %v304_v55  ;;  %v782_v55 = vld [vmem:[%s1567_s5 + $0x50] sm:$0xff]  ;;  %v783_v56 = vld [vmem:[%s1567_s5 + $0x58] sm:$0xff] }
  0xb4   :  { %v1289_v57 = vpack.c.bf16 %v783_v56, %v782_v55 }
  0xb5   :  { %1188 = vmatpush1.bf16.msra.mxu0 %v1187_v60  ;;  %v308_v60 = vld [vmem:[#allocation3 + $0x7a0] sm:$0xff] }
  0xb6   :  { %1190 = vmatprep.subr.bf16.mxu0 %v1189_v61  ;;  %v310_v61 = vld [vmem:[#allocation3 + $0x7b0] sm:$0xff] }
  0xb7   :  { %v1231_v0 = vpack.c.bf16 %v310_v61, %v308_v60  ;;  %v786_v60 = vld [vmem:[%s1567_s5 + $0x70] sm:$0xff]  ;;  %v787_v61 = vld [vmem:[%s1567_s5 + $0x78] sm:$0xff] }
  0xb8   :  { %v1295_v62 = vpack.c.bf16 %v787_v61, %v786_v60 }
  0xb9   :  { %1192 = vmatpush1.bf16.msra.mxu0 %v1191_v19  ;;  %v312_v19 = vld [vmem:[#allocation3 + $0x7c0] sm:$0xff] }
  0xba   :  { %1194 = vmatprep.subr.bf16.mxu0 %v1193_v2  ;;  %v314_v2 = vld [vmem:[#allocation3 + $0x7d0] sm:$0xff] }
  0xbb   :  { %v1235_v5 = vpack.c.bf16 %v314_v2, %v312_v19 }
  0xbd   :  { %1196 = vmatpush1.bf16.msra.mxu0 %v1195_v7  ;;  %v316_v7 = vld [vmem:[#allocation3 + $0x7e0] sm:$0xff] }
  0xbe   :  { %1198 = vmatprep.subr.bf16.mxu0 %v1197_v8  ;;  %v318_v8 = vld [vmem:[#allocation3 + $0x7f0] sm:$0xff] }
  0xbf   :  { %v1239_v17 = vpack.c.bf16 %v318_v8, %v316_v7 }
  0xc1   :  { %1200 = vmatpush1.bf16.msra.mxu0 %v1199_v13  ;;  %v674_v13 = vld [vmem:[#allocation5 + $0x60] sm:$0xff] }
  0xc2   :  { %1202 = vmatprep.subr.bf16.mxu0 %v1201_v14  ;;  %v675_v14 = vld [vmem:[#allocation5 + $0x68] sm:$0xff] }
  0xc3   :  { %v1267_v15 = vpack.c.bf16 %v675_v14, %v674_v13  ;;  %v897_v13 = vld [vmem:[#allocation2] ss:$0 sm:$0xff] }
  0xc5   :  { %1204 = vmatpush1.bf16.msra.mxu0 %v1203_v21  ;;  %1268 = vmatpush3.bf16.msra.mxu1 %v1267_v15  ;;  %v676_v21 = vld [vmem:[#allocation5 + $0x70] sm:$0xff] }
  0xc6   :  { %1206 = vmatprep.subr.bf16.mxu0 %v1205_v22  ;;  %v677_v22 = vld [vmem:[#allocation5 + $0x78] sm:$0xff]  ;;  %1270 = vmatprep.subr.bf16.mxu1 %v1269_v20 }
  0xc7   :  { %v1271_v23 = vpack.c.bf16 %v677_v22, %v676_v21 }
  0xc9   :  { %1208 = vmatpush1.bf16.msra.mxu0 %v1207_v27  ;;  %1272 = vmatpush3.bf16.msra.mxu1 %v1271_v23  ;;  %v320_v27 = vld [vmem:[%s1564_s2] sm:$0x3] }
  0xca   :  { %1210 = vmatprep.subr.bf16.mxu0 %v1209_v48  ;;  %1273 = vmatprep.subr.bf16.mxu1 %v1372_v24  ;;  %v328_v48 = vsub.s32 1, %v1452_v36  ;;  %v325_v28 = vrot.slane %v320_v27, %v324_v26  ;;  %v774_v36 = vld [vmem:[%s1567_s5 + $0x10] sm:$0xff] }
  0xcb   :  { %v1277_v43 = vpack.c.bf16 %v775_v42, %v774_v36 }
  0xcc   :  { %v329_v29 = vrot.slane %v320_v27, %v328_v48 }
  0xcd   :  { %1212 = vmatpush1.bf16.msra.mxu0 %v1211_v32 }
  0xce   :  { %1214 = vmatprep.subr.bf16.mxu0 %v1213_v33 }
  0xd1   :  { %1216 = vmatpush1.bf16.msra.mxu0 %v1215_v39 }
  0xd2   :  { %1218 = vmatprep.subr.bf16.mxu0 %v1217_v40  ;;  %v1274_v40 = vpack.c.bf16 %v773_v11, %v772_v35 }
  0xd5   :  { %1220 = vmatpush1.bf16.msra.mxu0 %v1219_v46  ;;  %v777_v46 = vld [vmem:[%s1567_s5 + $0x28] sm:$0xff] }
  0xd6   :  { %1222 = vmatprep.subr.bf16.mxu0 %v1221_v47  ;;  %v1280_v47 = vpack.c.bf16 %v777_v46, %v776_v45 }
  0xd9   :  { %1224 = vmatpush1.bf16.msra.mxu0 %v1223_v52  ;;  %v781_v52 = vld [vmem:[%s1567_s5 + $0x48] sm:$0xff] }
  0xda   :  { %1226 = vmatprep.subr.bf16.mxu0 %v1225_v54  ;;  %v1286_v54 = vpack.c.bf16 %v781_v52, %v780_v51 }
  0xdd   :  { %1228 = vmatpush1.bf16.msra.mxu0 %v1227_v59  ;;  %v785_v59 = vld [vmem:[%s1567_s5 + $0x68] sm:$0xff] }
  0xde   :  { %1230 = vmatprep.subr.bf16.mxu0 %v1229_v53  ;;  %v1292_v53 = vpack.c.bf16 %v785_v59, %v784_v58 }
  0xe1   :  { %1232 = vmatpush1.bf16.msra.mxu0 %v1231_v0 }
  0xe2   :  { %1234 = vmatprep.subr.bf16.mxu0 %v1233_v1  ;;  %v894_v1 = vld [vmem:[%s1566_s4] ss:$0 sm:$0xff] }
  0xe5   :  { %1236 = vmatpush1.bf16.msra.mxu0 %v1235_v5  ;;  %v895_v5 = vld [vmem:[%s1568_s6] ss:$0 sm:$0xff] }
  0xe6   :  { %1238 = vmatprep.subr.bf16.mxu0 %v1237_v6 }
  0xe9   :  { %1240 = vmatpush1.bf16.msra.mxu0 %v1239_v17  ;;  %v896_v17 = vld [vmem:[%s1569_s7] ss:$0 sm:$0xff] }
  0xec   :  { %654 = vmatmul.mubr.f32.vlgmr.msra.gmra.mrb[0].mxu0 %v1491_v37 }
 0x159   :  { %v442_v25 = vpop.f32.mrb[0].mxu1 }
 0x15a   :  { %v444_v37 = vpop.f32.mrb[1].mxu1  ;;  %v443_v30 = vadd.f32 %v442_v25, %v325_v28 }
 0x15b   :  { %v445_v31 = vadd.f32 %v444_v37, %v329_v29 }
 0x1bf   :  { %v655_v32 = vpop.f32.mrb[0].mxu0 }
 0x1c0   :  { %v1298_v33 = vadd.f32 %v655_v32, %v443_v30  ;;  %v657_v34 = vpop.f32.mrb[1].mxu0 }
 0x1c1   :  { %v1300_v38 = vadd.f32 %v657_v34, %v445_v31 }
 0x1c2   :  { %v660_v41 = vmax.f32 %v1298_v33, 0.0 }
 0x1c3   :  { %v661_v39 = vmax.f32 %v1300_v38, 0.0 }
 0x1c5   :  { %765 = vmatprep.mubr.f32.mxu1 %v661_v39 }
 0x1c6   :  { %766 = vmatmul.mubr.f32.vlgmr.msra.gmra.mrb[2].mxu1 %v660_v41 }
 0x1c7   :  { %1275 = vmatpush3.bf16.msra.mxu1 %v1274_v40  ;;  %982 = vmatprep.mubr.msk.f32.mxu1 %vm1373_vm0, %v1374_v63 }
 0x1c8   :  { %1276 = vmatprep.subr.bf16.mxu1 %v1372_v24 }
 0x1cb   :  { %1278 = vmatpush3.bf16.msra.mxu1 %v1277_v43 }
 0x1cc   :  { %1279 = vmatprep.subr.bf16.mxu1 %v1372_v24 }
 0x1cf   :  { %1281 = vmatpush3.bf16.msra.mxu1 %v1280_v47 }
 0x1d0   :  { %1282 = vmatprep.subr.bf16.mxu1 %v1372_v24 }
 0x1d3   :  { %1284 = vmatpush3.bf16.msra.mxu1 %v1283_v50 }
 0x1d4   :  { %1285 = vmatprep.subr.bf16.mxu1 %v1372_v24 }
 0x1d7   :  { %1287 = vmatpush3.bf16.msra.mxu1 %v1286_v54 }
 0x1d8   :  { %1288 = vmatprep.subr.bf16.mxu1 %v1372_v24 }
 0x1db   :  { %1290 = vmatpush3.bf16.msra.mxu1 %v1289_v57 }
 0x1dc   :  { %1291 = vmatprep.subr.bf16.mxu1 %v1372_v24 }
 0x1df   :  { %1293 = vmatpush3.bf16.msra.mxu1 %v1292_v53 }
 0x1e0   :  { %1294 = vmatprep.subr.bf16.mxu1 %v1372_v24 }
 0x1e3   :  { %1296 = vmatpush3.bf16.msra.mxu1 %v1295_v62 }
 0x299   :  { %v930_v0 = vpop.f32.mrb[2].mxu1 }
 0x29a   :  { %v931_v19 = vpop.f32.mrb[3].mxu1 }
 0x29b   :  { %v932_v2 = vadd.f32 %v931_v19, %v930_v0 }
 0x29d   :  { %v768_v3 = vadd.f32 %v932_v2, %v894_v1 }
 0x29f   :  { %v771_v4 = vmax.f32 %v768_v3, 0.0 }
 0x2a1   :  { %983 = vmatmul.mubr.f32.vlgmr.msra.gmra.mrb[4].mxu1 %v771_v4 }
 0x374   :  { %v861_v6 = vpop.f32.mrb[4].mxu1 }
 0x375   :  { %v862_v7 = vadd.f32 %v895_v5, %v861_v6  ;;  %v984_v8 = vpop.f32.mrb[5].mxu1 }
 0x377   :  { %v865_v9 = vmax.f32 %v862_v7, 0.0 }
 0x379   :  { %v873_v10 = vmul.f32 %v896_v17, %v865_v9 }
 0x37b   :  { %v875_v12 = vsel %vm874_vm1, %v873_v10, 0.0 }
 0x37c   :  { %876 = vadd.xlane.f32.xlu0 %v875_v12 }
 0x409   :  { %v877_v14 = vpop.xlane.xlu0 %876 }
 0x40a   :  { %v885_v15 = vadd.f32 %v897_v13, %v877_v14 }
 0x40c   :  { %887 = vst.msk [vmem:[%s1571_s9] sm:$0x3] %vm886_vm2, %v885_v15 }
 0x40d   :  { %892 = vsyncpa [#allocation4], 1 }
 0x40e   :  { %893 = vsyncpa [#allocation6], 1 }

// kernel: tpu_custom_call.1
= control target key start
LH: loop header
LB: loop body
LE: loop exit
PB: predicated region body
PF: predicated region fallthrough
CT: control target
= control target key end

     0   :  { %s1562_s0 = inlined_call_operand.vmem [shape: f32[2,1024], index: 0, kind: input, shape index: {}]   ;;  %s1563_s1 = inlined_call_operand.hbm [shape: f32[1024,256], index: 1, kind: input, shape index: {}]   ;;  %s1564_s2 = inlined_call_operand.vmem [shape: f32[1,256], index: 2, kind: input, shape index: {}]   ;;  %s1565_s3 = inlined_call_operand.hbm [shape: f32[256,128], index: 3, kind: input, shape index: {}]   ;;  %s1566_s4 = inlined_call_operand.vmem [shape: f32[1,128], index: 4, kind: input, shape index: {}]   ;;  %s1567_s5 = inlined_call_operand.vmem [shape: f32[128,16], index: 5, kind: input, shape index: {}]   ;;  %s1568_s6 = inlined_call_operand.vmem [shape: f32[1,16], index: 6, kind: input, shape index: {}]   ;;  %s1569_s7 = inlined_call_operand.vmem [shape: f32[1,16], index: 7, kind: input, shape index: {}]   ;;  %s1570_s8 = inlined_call_operand.<no memory space> [shape: f32[1,1], index: 8, kind: input, shape index: {}]   ;;  %s1571_s9 = inlined_call_operand.vmem [shape: f32[2,1], index: 9, kind: output, shape index: {}]  }
   0x1   :  { %v14_v0 = vstv %s1570_s8 }
   0x2   :  { %15 = vst [vmem:[#allocation2] sm:$0x1] %v14_v0 }
   0x3   :  { %16 = vsyncpa [#allocation4], 0 }
   0x4   :  { %17 = vsyncpa [#allocation6], 0  ;;  %s1365_s11 = smov [#allocation3]   ;;  %s1317_s15 = scalar_lea.hbm %s1563_s1, 32768 }
   0x5   :  { %s25_s12 = sshll.u32 %s1365_s11, 4  ;;  %p1318_p0 = scmp.ne.s32.totalorder %s1563_s1, %s1317_s15  ;;  %s26_s12 = int_to_ptr.vmem [resolvable:$true] %s25_s12 }
   0x6   :  { %p1321_p1 = scmp.lt.u32.totalorder %s1317_s15, %s1563_s1 }
   0x8   :  { %p1323_p2 = pnand %p1321_p1, %p1318_p0 }
   0xa   :  { %1326 = shalt.err (!%p1323_p2)
}
   0xb   :  { %s1327_s8 = scalar_lea.vmem %s26_s12, 32768  ;;  %p1332_p4 = scmp.lt.s32.totalorder %s26_s12, %s26_s12 }
   0xc   :  { %p1328_p3 = scmp.ne.s32.totalorder %s26_s12, %s1327_s8  ;;  %p1333_p5 = scmp.lt.s32.totalorder %s1327_s8, %s1327_s8 }
   0xe   :  { %p1334_p6 = por %p1333_p5, %p1332_p4 }
  0x10   :  { %p1335_p7 = pnand %p1334_p6, %p1328_p3 }
  0x12   :  { %1338 = shalt.err (!%p1335_p7)
}
  0x13   :  { %s1366_s20 = smov 256   ;;  %s1367_s21 = smov 16  }
  0x14   :  { %31 = dma.hbm_to_vmem [thread:$0]  %s1563_s1, 32768, %s26_s12, [#allocation4], %s1366_s20, %s1366_s20, %s1367_s21  }
  0x15   :  { %s1368_s24 = smov [#allocation5]   ;;  %s1339_s28 = scalar_lea.hbm %s1565_s3, 4096 }
  0x16   :  { %s39_s25 = sshll.u32 %s1368_s24, 4  ;;  %p1340_p8 = scmp.ne.s32.totalorder %s1565_s3, %s1339_s28  ;;  %s40_s25 = int_to_ptr.vmem [resolvable:$true] %s39_s25 }
  0x17   :  { %p1343_p9 = scmp.lt.u32.totalorder %s1339_s28, %s1565_s3 }
  0x19   :  { %p1345_p10 = pnand %p1343_p9, %p1340_p8 }
  0x1b   :  { %1348 = shalt.err (!%p1345_p10)
}
  0x1c   :  { %s1349_s13 = scalar_lea.vmem %s40_s25, 4096  ;;  %p1354_p12 = scmp.lt.s32.totalorder %s40_s25, %s40_s25 }
  0x1d   :  { %p1350_p11 = scmp.ne.s32.totalorder %s40_s25, %s1349_s13  ;;  %p1355_p13 = scmp.lt.s32.totalorder %s1349_s13, %s1349_s13 }
  0x1f   :  { %p1356_p0 = por %p1355_p13, %p1354_p12 }
  0x21   :  { %p1357_p1 = pnand %p1356_p0, %p1350_p11 }
  0x23   :  { %1360 = shalt.err (!%p1357_p1)
}
  0x24   :  { %s1369_s1 = smov 128   ;;  %s1370_s12 = smov 8  }
  0x25   :  { %45 = dma.hbm_to_vmem [thread:$0]  %s1565_s3, 4096, %s40_s25, [#allocation6], %s1369_s1, %s1369_s1, %s1370_s12  }
  0x26   :  { %1361 = dma.done.wait [#allocation4], 32768  }
  0x27   :  { %1362 = vsyncadd [#allocation4], 4294934528 }
  0x28   :  { %1363 = dma.done.wait [#allocation6], 4096  }
  0x29   :  { %1364 = vsyncadd [#allocation6], 4294963200  ;;  %v129_v1 = vld [vmem:[#allocation3 + $0x208] sm:$0xff]  ;;  %v131_v2 = vld [vmem:[#allocation3 + $0x218] sm:$0xff]  ;;  %v322_v27 = vlaneseq  ;;  %v1371_v28 = vmov 1983009808  }
  0x2a   :  { %v128_v3 = vld [vmem:[#allocation3 + $0x200] sm:$0xff]  ;;  %v1049_v4 = vpack.c.bf16 %v131_v2, %v129_v1  ;;  %v130_v5 = vld [vmem:[#allocation3 + $0x210] sm:$0xff]  ;;  %v133_v6 = vld [vmem:[#allocation3 + $0x228] sm:$0xff]  ;;  %v336_v29 = vunpack.c.l.s4 %v1371_v28  ;;  %vm1373_vm0 = vmmov 0   ;;  %vm874_vm1 = vcmask 123904  }
  0x2b   :  { %v135_v7 = vld [vmem:[#allocation3 + $0x238] sm:$0xff]  ;;  %v1051_v8 = vpack.c.bf16 %v130_v5, %v128_v3  ;;  %v132_v10 = vld [vmem:[#allocation3 + $0x220] sm:$0xff]  ;;  %v134_v11 = vld [vmem:[#allocation3 + $0x230] sm:$0xff]  ;;  %v1452_v36 = vshrl.u32 %v322_v27, 7  ;;  %vm886_vm2 = vcmask 1024  }
  0x2c   :  { %v1053_v9 = vpack.c.bf16 %v135_v7, %v133_v6  ;;  %v137_v12 = vld [vmem:[#allocation3 + $0x248] sm:$0xff]  ;;  %1050 = vmatprep.subr.bf16.mxu0 %v1049_v4  ;;  %v139_v13 = vld [vmem:[#allocation3 + $0x258] sm:$0xff]  ;;  %v1055_v14 = vpack.c.bf16 %v134_v11, %v132_v10  ;;  %v136_v16 = vld [vmem:[#allocation3 + $0x240] sm:$0xff]  ;;  %v337_v37 = vunpack.c.0.s8 %v336_v29 }
  0x2d   :  { %1052 = vmatpush1.bf16.msra.mxu0 %v1051_v8  ;;  %v1057_v15 = vpack.c.bf16 %v139_v13, %v137_v12  ;;  %v138_v17 = vld [vmem:[#allocation3 + $0x250] sm:$0xff]  ;;  %v141_v18 = vld [vmem:[#allocation3 + $0x268] sm:$0xff]  ;;  %v143_v19 = vld [vmem:[#allocation3 + $0x278] sm:$0xff] }
  0x2e   :  { %1054 = vmatprep.subr.bf16.mxu0 %v1053_v9  ;;  %v1059_v20 = vpack.c.bf16 %v138_v17, %v136_v16  ;;  %v1061_v21 = vpack.c.bf16 %v143_v19, %v141_v18  ;;  %v140_v22 = vld [vmem:[#allocation3 + $0x260] sm:$0xff]  ;;  %v142_v23 = vld [vmem:[#allocation3 + $0x270] sm:$0xff]  ;;  %v145_v24 = vld [vmem:[#allocation3 + $0x288] sm:$0xff]  ;;  %v1455_v44 = vsub.s32 %v337_v37, %v1452_v36 }
  0x2f   :  { %v147_v25 = vld [vmem:[#allocation3 + $0x298] sm:$0xff]  ;;  %v1063_v26 = vpack.c.bf16 %v142_v23, %v140_v22  ;;  %v144_v31 = vld [vmem:[#allocation3 + $0x280] sm:$0xff]  ;;  %v146_v32 = vld [vmem:[#allocation3 + $0x290] sm:$0xff] }
  0x30   :  { %v1065_v30 = vpack.c.bf16 %v147_v25, %v145_v24  ;;  %v149_v33 = vld [vmem:[#allocation3 + $0x2a8] sm:$0xff]  ;;  %v151_v34 = vld [vmem:[#allocation3 + $0x2b8] sm:$0xff]  ;;  %v1067_v35 = vpack.c.bf16 %v146_v32, %v144_v31  ;;  %v148_v39 = vld [vmem:[#allocation3 + $0x2a0] sm:$0xff] }
  0x31   :  { %1056 = vmatpush1.bf16.msra.mxu0 %v1055_v14  ;;  %v1069_v38 = vpack.c.bf16 %v151_v34, %v149_v33  ;;  %v150_v40 = vld [vmem:[#allocation3 + $0x2b0] sm:$0xff]  ;;  %v153_v41 = vld [vmem:[#allocation3 + $0x2c8] sm:$0xff]  ;;  %v155_v42 = vld [vmem:[#allocation3 + $0x2d8] sm:$0xff] }
  0x32   :  { %1058 = vmatprep.subr.bf16.mxu0 %v1057_v15  ;;  %v1071_v43 = vpack.c.bf16 %v150_v40, %v148_v39  ;;  %v1073_v45 = vpack.c.bf16 %v155_v42, %v153_v41  ;;  %v152_v46 = vld [vmem:[#allocation3 + $0x2c0] sm:$0xff]  ;;  %v154_v47 = vld [vmem:[#allocation3 + $0x2d0] sm:$0xff]  ;;  %v157_v49 = vld [vmem:[#allocation3 + $0x2e8] sm:$0xff] }
  0x33   :  { %v1460_v48 = vld [vmem:[%s1562_s0] sm:$0xff]  ;;  %v1075_v52 = vpack.c.bf16 %v154_v47, %v152_v46  ;;  %v158_v56 = vld [vmem:[#allocation3 + $0x2f0] sm:$0xff]  ;;  %v161_v57 = vld [vmem:[#allocation3 + $0x308] sm:$0xff] }
  0x34   :  { %v159_v50 = vld [vmem:[#allocation3 + $0x2f8] sm:$0xff]  ;;  %v334_v51 = vcombine.high %v1460_v48, %v1460_v48  ;;  %v156_v55 = vld [vmem:[#allocation3 + $0x2e0] sm:$0xff]  ;;  %v162_v63 = vld [vmem:[#allocation3 + $0x310] sm:$0xff] }
  0x35   :  { %1060 = vmatpush1.bf16.msra.mxu0 %v1059_v20  ;;  %v1077_v54 = vpack.c.bf16 %v159_v50, %v157_v49  ;;  %v163_v58 = vld [vmem:[#allocation3 + $0x318] sm:$0xff]  ;;  %v1079_v60 = vpack.c.bf16 %v158_v56, %v156_v55  ;;  %v160_v62 = vld [vmem:[#allocation3 + $0x300] sm:$0xff]  ;;  %v165_v0 = vld [vmem:[#allocation3 + $0x328] sm:$0xff] }
  0x36   :  { %1062 = vmatprep.subr.bf16.mxu0 %v1061_v21  ;;  %v1465_v53 = vrot.slane %v334_v51, %v1455_v44  ;;  %v1081_v61 = vpack.c.bf16 %v163_v58, %v161_v57  ;;  %v167_v1 = vld [vmem:[#allocation3 + $0x338] sm:$0xff]  ;;  %v1083_v2 = vpack.c.bf16 %v162_v63, %v160_v62  ;;  %v164_v4 = vld [vmem:[#allocation3 + $0x320] sm:$0xff]  ;;  %v166_v5 = vld [vmem:[#allocation3 + $0x330] sm:$0xff] }
  0x37   :  { %v1085_v3 = vpack.c.bf16 %v167_v1, %v165_v0  ;;  %v169_v6 = vld [vmem:[#allocation3 + $0x348] sm:$0xff]  ;;  %v171_v7 = vld [vmem:[#allocation3 + $0x358] sm:$0xff]  ;;  %v1087_v8 = vpack.c.bf16 %v166_v5, %v164_v4  ;;  %v168_v10 = vld [vmem:[#allocation3 + $0x340] sm:$0xff] }
  0x38   :  { %v350_v59 = vcombine.high %v1465_v53, %v1465_v53  ;;  %v1089_v9 = vpack.c.bf16 %v171_v7, %v169_v6  ;;  %v170_v11 = vld [vmem:[#allocation3 + $0x350] sm:$0xff]  ;;  %v173_v12 = vld [vmem:[#allocation3 + $0x368] sm:$0xff]  ;;  %v175_v13 = vld [vmem:[#allocation3 + $0x378] sm:$0xff] }
  0x39   :  { %1064 = vmatpush1.bf16.msra.mxu0 %v1063_v26  ;;  %v1091_v14 = vpack.c.bf16 %v170_v11, %v168_v10  ;;  %v1093_v15 = vpack.c.bf16 %v175_v13, %v173_v12  ;;  %v172_v16 = vld [vmem:[#allocation3 + $0x360] sm:$0xff]  ;;  %v174_v17 = vld [vmem:[#allocation3 + $0x370] sm:$0xff]  ;;  %v177_v18 = vld [vmem:[#allocation3 + $0x388] sm:$0xff] }
  0x3a   :  { %1066 = vmatprep.subr.bf16.mxu0 %v1065_v30  ;;  %511 = vmatprep.mubr.f32.mxu0 %v350_v59  ;;  %v179_v19 = vld [vmem:[#allocation3 + $0x398] sm:$0xff]  ;;  %v65_v20 = vld [vmem:[#allocation3 + $0x8] sm:$0xff]  ;;  %v64_v23 = vld [vmem:[#allocation3] sm:$0xff]  ;;  %v1095_v24 = vpack.c.bf16 %v174_v17, %v172_v16  ;;  %v1476_v17 = vrot.slane %v1460_v48, %v1455_v44 }
  0x3b   :  { %v67_v21 = vld [vmem:[#allocation3 + $0x18] sm:$0xff]  ;;  %v176_v25 = vld [vmem:[#allocation3 + $0x380] sm:$0xff]  ;;  %v66_v26 = vld [vmem:[#allocation3 + $0x10] sm:$0xff]  ;;  %v1097_v27 = vpack.c.bf16 %v179_v19, %v177_v18 }
  0x3c   :  { %v985_v22 = vpack.c.bf16 %v67_v21, %v65_v20  ;;  %v178_v28 = vld [vmem:[#allocation3 + $0x390] sm:$0xff]  ;;  %v987_v29 = vpack.c.bf16 %v66_v26, %v64_v23  ;;  %v69_v30 = vld [vmem:[#allocation3 + $0x28] sm:$0xff]  ;;  %v71_v31 = vld [vmem:[#allocation3 + $0x38] sm:$0xff] }
  0x3d   :  { %1068 = vmatpush1.bf16.msra.mxu0 %v1067_v35  ;;  %v181_v32 = vld [vmem:[#allocation3 + $0x3a8] sm:$0xff]  ;;  %v183_v33 = vld [vmem:[#allocation3 + $0x3b8] sm:$0xff]  ;;  %v989_v34 = vpack.c.bf16 %v71_v31, %v69_v30  ;;  %v68_v35 = vld [vmem:[#allocation3 + $0x20] sm:$0xff] }
  0x3e   :  { %1070 = vmatprep.subr.bf16.mxu0 %v1069_v38  ;;  %986 = vmatprep.subr.bf16.mxu1 %v985_v22  ;;  %v70_v37 = vld [vmem:[#allocation3 + $0x30] sm:$0xff]  ;;  %v1099_v38 = vpack.c.bf16 %v178_v28, %v176_v25  ;;  %v180_v39 = vld [vmem:[#allocation3 + $0x3a0] sm:$0xff]  ;;  %v73_v41 = vld [vmem:[#allocation3 + $0x48] sm:$0xff] }
  0x3f   :  { %988 = vmatpush1.bf16.msra.mxu1 %v987_v29  ;;  %v991_v40 = vpack.c.bf16 %v70_v37, %v68_v35  ;;  %v75_v42 = vld [vmem:[#allocation3 + $0x58] sm:$0xff]  ;;  %v72_v47 = vld [vmem:[#allocation3 + $0x40] sm:$0xff]  ;;  %v74_v49 = vld [vmem:[#allocation3 + $0x50] sm:$0xff] }
  0x40   :  { %990 = vmatprep.subr.bf16.mxu1 %v989_v34  ;;  %v993_v46 = vpack.c.bf16 %v75_v42, %v73_v41  ;;  %v185_v50 = vld [vmem:[#allocation3 + $0x3c8] sm:$0xff]  ;;  %v187_v51 = vld [vmem:[#allocation3 + $0x3d8] sm:$0xff]  ;;  %v184_v57 = vld [vmem:[#allocation3 + $0x3c0] sm:$0xff] }
  0x41   :  { %1072 = vmatpush1.bf16.msra.mxu0 %v1071_v43  ;;  %v1101_v43 = vpack.c.bf16 %v183_v33, %v181_v32  ;;  %v79_v55 = vld [vmem:[#allocation3 + $0x78] sm:$0xff]  ;;  %v76_v59 = vld [vmem:[#allocation3 + $0x60] sm:$0xff]  ;;  %v186_v62 = vld [vmem:[#allocation3 + $0x3d0] sm:$0xff] }
  0x42   :  { %1074 = vmatprep.subr.bf16.mxu0 %v1073_v45  ;;  %v182_v45 = vld [vmem:[#allocation3 + $0x3b0] sm:$0xff]  ;;  %v81_v63 = vld [vmem:[#allocation3 + $0x88] sm:$0xff]  ;;  %v83_v0 = vld [vmem:[#allocation3 + $0x98] sm:$0xff]  ;;  %v1107_v5 = vpack.c.bf16 %v186_v62, %v184_v57 }
  0x43   :  { %992 = vmatpush1.bf16.msra.mxu1 %v991_v40  ;;  %v1103_v56 = vpack.c.bf16 %v182_v45, %v180_v39  ;;  %v189_v1 = vld [vmem:[#allocation3 + $0x3e8] sm:$0xff]  ;;  %v190_v6 = vld [vmem:[#allocation3 + $0x3f0] sm:$0xff]  ;;  %v1001_v7 = vpack.c.bf16 %v83_v0, %v81_v63  ;;  %v87_v13 = vld [vmem:[#allocation3 + $0xb8] sm:$0xff] }
  0x44   :  { %994 = vmatprep.subr.bf16.mxu1 %v993_v46  ;;  %v1472_v11 = vld [vmem:[%s1562_s0 + $0x8] sm:$0xff]  ;;  %v86_v22 = vld [vmem:[#allocation3 + $0xb0] sm:$0xff]  ;;  %v199_v48 = vld [vmem:[#allocation3 + $0x438] sm:$0xff] }
  0x45   :  { %1076 = vmatpush1.bf16.msra.mxu0 %v1075_v52  ;;  %v77_v52 = vld [vmem:[#allocation3 + $0x68] sm:$0xff]  ;;  %v1480_v19 = vrot.slane %v1472_v11, %v1455_v44  ;;  %v84_v21 = vld [vmem:[#allocation3 + $0xa0] sm:$0xff]  ;;  %v194_v25 = vld [vmem:[#allocation3 + $0x410] sm:$0xff] }
  0x46   :  { %1078 = vmatprep.subr.bf16.mxu0 %v1077_v54  ;;  %v995_v54 = vpack.c.bf16 %v74_v49, %v72_v47  ;;  %v997_v58 = vpack.c.bf16 %v79_v55, %v77_v52  ;;  %v85_v12 = vld [vmem:[#allocation3 + $0xa8] sm:$0xff]  ;;  %v91_v29 = vld [vmem:[#allocation3 + $0xd8] sm:$0xff]  ;;  %v1007_v30 = vpack.c.bf16 %v86_v22, %v84_v21  ;;  %v196_v32 = vld [vmem:[#allocation3 + $0x420] sm:$0xff] }
  0x47   :  { %v1005_v20 = vpack.c.bf16 %v87_v13, %v85_v12  ;;  %v197_v26 = vld [vmem:[#allocation3 + $0x428] sm:$0xff]  ;;  %v366_v33 = vcombine.high %v1480_v19, %v1480_v19  ;;  %v88_v34 = vld [vmem:[#allocation3 + $0xc0] sm:$0xff]  ;;  %v90_v35 = vld [vmem:[#allocation3 + $0xd0] sm:$0xff] }
  0x48   :  { %996 = vmatpush1.bf16.msra.mxu1 %v995_v54  ;;  %v89_v28 = vld [vmem:[#allocation3 + $0xc8] sm:$0xff]  ;;  %v1117_v37 = vpack.c.bf16 %v199_v48, %v197_v26  ;;  %v95_v41 = vld [vmem:[#allocation3 + $0xf8] sm:$0xff]  ;;  %v1011_v45 = vpack.c.bf16 %v90_v35, %v88_v34  ;;  %v200_v47 = vld [vmem:[#allocation3 + $0x440] sm:$0xff] }
  0x49   :  { %1080 = vmatpush1.bf16.msra.mxu0 %v1079_v60  ;;  %v78_v60 = vld [vmem:[#allocation3 + $0x70] sm:$0xff]  ;;  %998 = vmatprep.subr.bf16.mxu1 %v997_v58  ;;  %v1009_v39 = vpack.c.bf16 %v91_v29, %v89_v28  ;;  %v93_v40 = vld [vmem:[#allocation3 + $0xe8] sm:$0xff]  ;;  %v207_v58 = vld [vmem:[#allocation3 + $0x478] sm:$0xff] }
  0x4a   :  { %1082 = vmatprep.subr.bf16.mxu0 %v1081_v61  ;;  %v1105_v61 = vpack.c.bf16 %v187_v51, %v185_v50  ;;  %v999_v4 = vpack.c.bf16 %v78_v60, %v76_v59  ;;  %v201_v42 = vld [vmem:[#allocation3 + $0x448] sm:$0xff]  ;;  %v1013_v49 = vpack.c.bf16 %v95_v41, %v93_v40  ;;  %v92_v50 = vld [vmem:[#allocation3 + $0xe0] sm:$0xff]  ;;  %v94_v51 = vld [vmem:[#allocation3 + $0xf0] sm:$0xff] }
  0x4b   :  { %v202_v54 = vld [vmem:[#allocation3 + $0x450] sm:$0xff]  ;;  %v97_v55 = vld [vmem:[#allocation3 + $0x108] sm:$0xff]  ;;  %v1015_v59 = vpack.c.bf16 %v94_v51, %v92_v50  ;;  %v204_v60 = vld [vmem:[#allocation3 + $0x460] sm:$0xff] }
  0x4c   :  { %1000 = vmatpush1.bf16.msra.mxu1 %v999_v4  ;;  %v205_v57 = vld [vmem:[#allocation3 + $0x468] sm:$0xff]  ;;  %v96_v62 = vld [vmem:[#allocation3 + $0x100] sm:$0xff]  ;;  %v98_v63 = vld [vmem:[#allocation3 + $0x110] sm:$0xff] }
  0x4d   :  { %1084 = vmatpush1.bf16.msra.mxu0 %v1083_v2  ;;  %v191_v2 = vld [vmem:[#allocation3 + $0x3f8] sm:$0xff]  ;;  %1002 = vmatprep.subr.bf16.mxu1 %v1001_v7  ;;  %v1125_v0 = vpack.c.bf16 %v207_v58, %v205_v57  ;;  %v209_v4 = vld [vmem:[#allocation3 + $0x488] sm:$0xff]  ;;  %v102_v12 = vld [vmem:[#allocation3 + $0x130] sm:$0xff] }
  0x4e   :  { %1086 = vmatprep.subr.bf16.mxu0 %v1085_v3  ;;  %v188_v3 = vld [vmem:[#allocation3 + $0x3e0] sm:$0xff]  ;;  %v1109_v10 = vpack.c.bf16 %v191_v2, %v189_v1  ;;  %v206_v1 = vld [vmem:[#allocation3 + $0x470] sm:$0xff]  ;;  %v101_v2 = vld [vmem:[#allocation3 + $0x128] sm:$0xff] }
  0x4f   :  { %v1111_v18 = vpack.c.bf16 %v190_v6, %v188_v3  ;;  %v103_v3 = vld [vmem:[#allocation3 + $0x138] sm:$0xff]  ;;  %v1019_v6 = vpack.c.bf16 %v98_v63, %v96_v62  ;;  %v1127_v7 = vpack.c.bf16 %v206_v1, %v204_v60  ;;  %v106_v26 = vld [vmem:[#allocation3 + $0x150] sm:$0xff]  ;;  %v109_v28 = vld [vmem:[#allocation3 + $0x168] sm:$0xff] }
  0x50   :  { %v214_v48 = vld [vmem:[#allocation3 + $0x4b0] sm:$0xff]  ;;  %v111_v29 = vld [vmem:[#allocation3 + $0x178] sm:$0xff]  ;;  %v216_v34 = vld [vmem:[#allocation3 + $0x4c0] sm:$0xff] }
  0x51   :  { %1088 = vmatpush1.bf16.msra.mxu0 %v1087_v8  ;;  %v80_v8 = vld [vmem:[#allocation3 + $0x80] sm:$0xff]  ;;  %v1029_v35 = vpack.c.bf16 %v111_v29, %v109_v28  ;;  %v218_v40 = vld [vmem:[#allocation3 + $0x4d0] sm:$0xff]  ;;  %v113_v41 = vld [vmem:[#allocation3 + $0x188] sm:$0xff] }
  0x52   :  { %1090 = vmatprep.subr.bf16.mxu0 %v1089_v9  ;;  %v82_v9 = vld [vmem:[#allocation3 + $0x90] sm:$0xff]  ;;  %v112_v51 = vld [vmem:[#allocation3 + $0x180] sm:$0xff]  ;;  %v119_v57 = vld [vmem:[#allocation3 + $0x1b8] sm:$0xff] }
  0x53   :  { %v1003_v16 = vpack.c.bf16 %v82_v9, %v80_v8  ;;  %v208_v8 = vld [vmem:[#allocation3 + $0x480] sm:$0xff]  ;;  %v1021_v9 = vpack.c.bf16 %v103_v3, %v101_v2  ;;  %v225_v58 = vld [vmem:[#allocation3 + $0x508] sm:$0xff]  ;;  %v226_v2 = vld [vmem:[#allocation3 + $0x510] sm:$0xff] }
  0x54   :  { %v116_v63 = vld [vmem:[#allocation3 + $0x1a0] sm:$0xff]  ;;  %v121_v3 = vld [vmem:[#allocation3 + $0x1c8] sm:$0xff]  ;;  %v234_v28 = vld [vmem:[#allocation3 + $0x550] sm:$0xff] }
  0x55   :  { %1092 = vmatpush1.bf16.msra.mxu0 %v1091_v14  ;;  %v193_v14 = vld [vmem:[#allocation3 + $0x408] sm:$0xff]  ;;  %1004 = vmatpush1.bf16.msra.mxu1 %v1003_v16  ;;  %v107_v16 = vld [vmem:[#allocation3 + $0x158] sm:$0xff]  ;;  %v678_v29 = vld [vmem:[#allocation5 + $0x80] sm:$0xff] }
  0x56   :  { %1094 = vmatprep.subr.bf16.mxu0 %v1093_v15  ;;  %v195_v15 = vld [vmem:[#allocation3 + $0x418] sm:$0xff]  ;;  %1006 = vmatprep.subr.bf16.mxu1 %v1005_v20 }
  0x57   :  { %v1113_v23 = vpack.c.bf16 %v195_v15, %v193_v14  ;;  %v210_v14 = vld [vmem:[#allocation3 + $0x490] sm:$0xff]  ;;  %v105_v15 = vld [vmem:[#allocation3 + $0x148] sm:$0xff]  ;;  %v215_v20 = vld [vmem:[#allocation3 + $0x4b8] sm:$0xff] }
  0x58   :  { %v1131_v22 = vpack.c.bf16 %v210_v14, %v208_v8 }
  0x59   :  { %1096 = vmatpush1.bf16.msra.mxu0 %v1095_v24  ;;  %v192_v24 = vld [vmem:[#allocation3 + $0x400] sm:$0xff]  ;;  %1008 = vmatpush1.bf16.msra.mxu1 %v1007_v30  ;;  %v217_v30 = vld [vmem:[#allocation3 + $0x4c8] sm:$0xff] }
  0x5a   :  { %1098 = vmatprep.subr.bf16.mxu0 %v1097_v27  ;;  %v349_v27 = vcombine.high %v1476_v17, %v1476_v17  ;;  %v1115_v31 = vpack.c.bf16 %v194_v25, %v192_v24  ;;  %1010 = vmatprep.subr.bf16.mxu1 %v1009_v39  ;;  %v1025_v24 = vpack.c.bf16 %v107_v16, %v105_v15  ;;  %v104_v25 = vld [vmem:[#allocation3 + $0x140] sm:$0xff]  ;;  %v230_v15 = vld [vmem:[#allocation3 + $0x530] sm:$0xff]  ;;  %v125_v16 = vld [vmem:[#allocation3 + $0x1e8] sm:$0xff] }
  0x5c   :  { %440 = vmatprep.mubr.f32.mxu1 %v349_v27 }
  0x5d   :  { %1100 = vmatpush1.bf16.msra.mxu0 %v1099_v38  ;;  %v198_v38 = vld [vmem:[#allocation3 + $0x430] sm:$0xff]  ;;  %1012 = vmatpush1.bf16.msra.mxu1 %v1011_v45  ;;  %v223_v45 = vld [vmem:[#allocation3 + $0x4f8] sm:$0xff] }
  0x5e   :  { %1102 = vmatprep.subr.bf16.mxu0 %v1101_v43  ;;  %v203_v43 = vld [vmem:[#allocation3 + $0x458] sm:$0xff]  ;;  %v1119_v46 = vpack.c.bf16 %v198_v38, %v196_v32  ;;  %1014 = vmatprep.subr.bf16.mxu1 %v1013_v49  ;;  %v1027_v32 = vpack.c.bf16 %v106_v26, %v104_v25  ;;  %v110_v38 = vld [vmem:[#allocation3 + $0x170] sm:$0xff]  ;;  %v220_v49 = vld [vmem:[#allocation3 + $0x4e0] sm:$0xff] }
  0x5f   :  { %v1121_v52 = vpack.c.bf16 %v203_v43, %v201_v42  ;;  %v115_v42 = vld [vmem:[#allocation3 + $0x198] sm:$0xff]  ;;  %v221_v43 = vld [vmem:[#allocation3 + $0x4e8] sm:$0xff]  ;;  %v124_v26 = vld [vmem:[#allocation3 + $0x1e0] sm:$0xff] }
  0x60   :  { %v1033_v50 = vpack.c.bf16 %v115_v42, %v113_v41  ;;  %v238_v41 = vld [vmem:[#allocation3 + $0x570] sm:$0xff] }
  0x61   :  { %1104 = vmatpush1.bf16.msra.mxu0 %v1103_v56  ;;  %v99_v56 = vld [vmem:[#allocation3 + $0x118] sm:$0xff]  ;;  %1016 = vmatpush1.bf16.msra.mxu1 %v1015_v59  ;;  %v680_v42 = vld [vmem:[#allocation5 + $0x90] sm:$0xff] }
  0x62   :  { %1106 = vmatprep.subr.bf16.mxu0 %v1105_v61  ;;  %v1017_v61 = vpack.c.bf16 %v99_v56, %v97_v55  ;;  %v222_v55 = vld [vmem:[#allocation3 + $0x4f0] sm:$0xff]  ;;  %v117_v56 = vld [vmem:[#allocation3 + $0x1a8] sm:$0xff]  ;;  %v227_v59 = vld [vmem:[#allocation3 + $0x518] sm:$0xff] }
  0x63   :  { %v1143_v60 = vpack.c.bf16 %v222_v55, %v220_v49  ;;  %v1037_v62 = vpack.c.bf16 %v119_v57, %v117_v56  ;;  %v1145_v1 = vpack.c.bf16 %v227_v59, %v225_v58  ;;  %v242_v56 = vld [vmem:[#allocation3 + $0x590] sm:$0xff]  ;;  %v682_v57 = vld [vmem:[#allocation5 + $0xa0] sm:$0xff]  ;;  %v683_v58 = vld [vmem:[#allocation5 + $0xa8] sm:$0xff] }
  0x64   :  { %1018 = vmatprep.subr.bf16.mxu1 %v1017_v61  ;;  %v224_v61 = vld [vmem:[#allocation3 + $0x500] sm:$0xff]  ;;  %v245_v59 = vld [vmem:[#allocation3 + $0x5a8] sm:$0xff] }
  0x65   :  { %1108 = vmatpush1.bf16.msra.mxu0 %v1107_v5  ;;  %v211_v5 = vld [vmem:[#allocation3 + $0x498] sm:$0xff]  ;;  %1020 = vmatpush1.bf16.msra.mxu1 %v1019_v6  ;;  %v1147_v8 = vpack.c.bf16 %v226_v2, %v224_v61 }
  0x66   :  { %1110 = vmatprep.subr.bf16.mxu0 %v1109_v10  ;;  %v100_v10 = vld [vmem:[#allocation3 + $0x120] sm:$0xff]  ;;  %v1129_v13 = vpack.c.bf16 %v211_v5, %v209_v4  ;;  %1022 = vmatprep.subr.bf16.mxu1 %v1021_v9  ;;  %v123_v4 = vld [vmem:[#allocation3 + $0x1d8] sm:$0xff]  ;;  %v229_v5 = vld [vmem:[#allocation3 + $0x528] sm:$0xff] }
  0x67   :  { %v1023_v21 = vpack.c.bf16 %v102_v12, %v100_v10  ;;  %v231_v6 = vld [vmem:[#allocation3 + $0x538] sm:$0xff]  ;;  %v228_v9 = vld [vmem:[#allocation3 + $0x520] sm:$0xff]  ;;  %v1041_v10 = vpack.c.bf16 %v123_v4, %v121_v3  ;;  %v246_v3 = vld [vmem:[#allocation3 + $0x5b0] sm:$0xff] }
  0x68   :  { %v120_v12 = vld [vmem:[#allocation3 + $0x1c0] sm:$0xff]  ;;  %v1149_v14 = vpack.c.bf16 %v231_v6, %v229_v5  ;;  %v684_v4 = vld [vmem:[#allocation5 + $0xb0] sm:$0xff]  ;;  %v685_v5 = vld [vmem:[#allocation5 + $0xb8] sm:$0xff] }
  0x69   :  { %1112 = vmatpush1.bf16.msra.mxu0 %v1111_v18  ;;  %v213_v18 = vld [vmem:[#allocation3 + $0x4a8] sm:$0xff]  ;;  %1024 = vmatpush1.bf16.msra.mxu1 %v1023_v21  ;;  %v235_v21 = vld [vmem:[#allocation3 + $0x558] sm:$0xff] }
  0x6a   :  { %1114 = vmatprep.subr.bf16.mxu0 %v1113_v23  ;;  %v212_v23 = vld [vmem:[#allocation3 + $0x4a0] sm:$0xff]  ;;  %v1133_v27 = vpack.c.bf16 %v215_v20, %v213_v18  ;;  %1026 = vmatprep.subr.bf16.mxu1 %v1025_v24  ;;  %v127_v18 = vld [vmem:[#allocation3 + $0x1f8] sm:$0xff]  ;;  %v233_v20 = vld [vmem:[#allocation3 + $0x548] sm:$0xff] }
  0x6b   :  { %v232_v24 = vld [vmem:[#allocation3 + $0x540] sm:$0xff]  ;;  %v1045_v25 = vpack.c.bf16 %v127_v18, %v125_v16  ;;  %v249_v6 = vld [vmem:[#allocation3 + $0x5c8] sm:$0xff] }
  0x6c   :  { %512 = vmatmul.mubr.f32.vlgmr.msra.gmra.mrb[0].mxu0 %v1465_v53  ;;  %v1123_v53 = vpack.c.bf16 %v202_v54, %v200_v47  ;;  %v1139_v47 = vpack.c.bf16 %v218_v40, %v216_v34  ;;  %v1141_v54 = vpack.c.bf16 %v223_v45, %v221_v43  ;;  %v1155_v34 = vpack.c.bf16 %v234_v28, %v232_v24  ;;  %v681_v43 = vld [vmem:[#allocation5 + $0x98] sm:$0xff]  ;;  %v241_v45 = vld [vmem:[#allocation3 + $0x588] sm:$0xff]  ;;  %v686_v16 = vld [vmem:[#allocation5 + $0xc0] sm:$0xff] }
  0x6d   :  { %1116 = vmatpush1.bf16.msra.mxu0 %v1115_v31  ;;  %582 = vmatprep.mubr.f32.mxu0 %v366_v33  ;;  %v219_v31 = vld [vmem:[#allocation3 + $0x4d8] sm:$0xff]  ;;  %v1135_v33 = vpack.c.bf16 %v214_v48, %v212_v23  ;;  %v1151_v23 = vpack.c.bf16 %v230_v15, %v228_v9  ;;  %v1153_v48 = vpack.c.bf16 %v235_v21, %v233_v20  ;;  %v248_v9 = vld [vmem:[#allocation3 + $0x5c0] sm:$0xff]  ;;  %v250_v15 = vld [vmem:[#allocation3 + $0x5d0] sm:$0xff] }
  0x6e   :  { %1118 = vmatprep.subr.bf16.mxu0 %v1117_v37  ;;  %v108_v37 = vld [vmem:[#allocation3 + $0x160] sm:$0xff]  ;;  %v1137_v39 = vpack.c.bf16 %v219_v31, %v217_v30  ;;  %1028 = vmatpush1.bf16.msra.mxu1 %v1027_v32  ;;  %v679_v30 = vld [vmem:[#allocation5 + $0x88] sm:$0xff]  ;;  %v239_v32 = vld [vmem:[#allocation3 + $0x578] sm:$0xff] }
  0x6f   :  { %1030 = vmatprep.subr.bf16.mxu1 %v1029_v35  ;;  %v237_v31 = vld [vmem:[#allocation3 + $0x568] sm:$0xff]  ;;  %v236_v35 = vld [vmem:[#allocation3 + $0x560] sm:$0xff]  ;;  %v255_v21 = vld [vmem:[#allocation3 + $0x5f8] sm:$0xff] }
  0x70   :  { %v1157_v40 = vpack.c.bf16 %v239_v32, %v237_v31  ;;  %v1159_v49 = vpack.c.bf16 %v238_v41, %v236_v35  ;;  %v687_v18 = vld [vmem:[#allocation5 + $0xc8] sm:$0xff]  ;;  %v252_v24 = vld [vmem:[#allocation3 + $0x5e0] sm:$0xff]  ;;  %v689_v31 = vld [vmem:[#allocation5 + $0xd8] sm:$0xff] }
  0x71   :  { %1120 = vmatpush1.bf16.msra.mxu0 %v1119_v46  ;;  %v1031_v46 = vpack.c.bf16 %v110_v38, %v108_v37  ;;  %v1241_v37 = vpack.c.bf16 %v679_v30, %v678_v29  ;;  %v662_v38 = vld [vmem:[#allocation5] sm:$0xff]  ;;  %v253_v20 = vld [vmem:[#allocation3 + $0x5e8] sm:$0xff]  ;;  %v254_v29 = vld [vmem:[#allocation3 + $0x5f0] sm:$0xff] }
  0x72   :  { %1122 = vmatprep.subr.bf16.mxu0 %v1121_v52  ;;  %v114_v52 = vld [vmem:[#allocation3 + $0x190] sm:$0xff]  ;;  %v1173_v28 = vpack.c.bf16 %v255_v21, %v253_v20  ;;  %v257_v32 = vld [vmem:[#allocation3 + $0x608] sm:$0xff]  ;;  %v1175_v35 = vpack.c.bf16 %v254_v29, %v252_v24  ;;  %v256_v41 = vld [vmem:[#allocation3 + $0x600] sm:$0xff] }
  0x73   :  { %1032 = vmatpush1.bf16.msra.mxu1 %v1031_v46  ;;  %v243_v46 = vld [vmem:[#allocation3 + $0x598] sm:$0xff]  ;;  %v688_v30 = vld [vmem:[#allocation5 + $0xd0] sm:$0xff] }
  0x74   :  { %1034 = vmatprep.subr.bf16.mxu1 %v1033_v50  ;;  %v240_v50 = vld [vmem:[#allocation3 + $0x580] sm:$0xff]  ;;  %v1161_v55 = vpack.c.bf16 %v243_v46, %v241_v45  ;;  %v263_v45 = vld [vmem:[#allocation3 + $0x638] sm:$0xff]  ;;  %v286_v24 = vld [vmem:[#allocation3 + $0x6f0] sm:$0xff] }
  0x75   :  { %1124 = vmatpush1.bf16.msra.mxu0 %v1123_v53  ;;  %v1035_v53 = vpack.c.bf16 %v114_v52, %v112_v51  ;;  %v1245_v51 = vpack.c.bf16 %v681_v43, %v680_v42  ;;  %v664_v52 = vld [vmem:[#allocation5 + $0x10] sm:$0xff]  ;;  %v1163_v61 = vpack.c.bf16 %v242_v56, %v240_v50  ;;  %v261_v43 = vld [vmem:[#allocation3 + $0x628] sm:$0xff]  ;;  %v260_v50 = vld [vmem:[#allocation3 + $0x620] sm:$0xff] }
  0x76   :  { %1126 = vmatprep.subr.bf16.mxu0 %v1125_v0  ;;  %v118_v0 = vld [vmem:[#allocation3 + $0x1b0] sm:$0xff]  ;;  %v287_v20 = vld [vmem:[#allocation3 + $0x6f8] sm:$0xff] }
  0x77   :  { %1036 = vmatpush1.bf16.msra.mxu1 %v1035_v53  ;;  %v247_v53 = vld [vmem:[#allocation3 + $0x5b8] sm:$0xff]  ;;  %v258_v42 = vld [vmem:[#allocation3 + $0x610] sm:$0xff] }
  0x78   :  { %1038 = vmatprep.subr.bf16.mxu1 %v1037_v62  ;;  %v244_v62 = vld [vmem:[#allocation3 + $0x5a0] sm:$0xff]  ;;  %v1165_v2 = vpack.c.bf16 %v247_v53, %v245_v59  ;;  %v269_v59 = vld [vmem:[#allocation3 + $0x668] sm:$0xff]  ;;  %v271_v53 = vld [vmem:[#allocation3 + $0x678] sm:$0xff] }
  0x79   :  { %1128 = vmatpush1.bf16.msra.mxu0 %v1127_v7  ;;  %v1039_v7 = vpack.c.bf16 %v118_v0, %v116_v63  ;;  %v1249_v63 = vpack.c.bf16 %v683_v58, %v682_v57  ;;  %v666_v0 = vld [vmem:[#allocation5 + $0x20] sm:$0xff]  ;;  %v266_v58 = vld [vmem:[#allocation3 + $0x650] sm:$0xff] }
  0x7a   :  { %1130 = vmatprep.subr.bf16.mxu0 %v1129_v13  ;;  %v122_v13 = vld [vmem:[#allocation3 + $0x1d0] sm:$0xff]  ;;  %v264_v57 = vld [vmem:[#allocation3 + $0x640] sm:$0xff] }
  0x7b   :  { %1040 = vmatpush1.bf16.msra.mxu1 %v1039_v7  ;;  %v251_v7 = vld [vmem:[#allocation3 + $0x5d8] sm:$0xff]  ;;  %v290_v29 = vld [vmem:[#allocation3 + $0x710] sm:$0xff] }
  0x7c   :  { %1042 = vmatprep.subr.bf16.mxu1 %v1041_v10  ;;  %v1253_v10 = vpack.c.bf16 %v685_v5, %v684_v4  ;;  %v274_v4 = vld [vmem:[#allocation3 + $0x690] sm:$0xff]  ;;  %v277_v5 = vld [vmem:[#allocation3 + $0x6a8] sm:$0xff] }
  0x7d   :  { %1132 = vmatpush1.bf16.msra.mxu0 %v1131_v22  ;;  %v1043_v22 = vpack.c.bf16 %v122_v13, %v120_v12  ;;  %v668_v12 = vld [vmem:[#allocation5 + $0x30] sm:$0xff]  ;;  %v669_v13 = vld [vmem:[#allocation5 + $0x38] sm:$0xff] }
  0x7e   :  { %1134 = vmatprep.subr.bf16.mxu0 %v1133_v27  ;;  %v126_v27 = vld [vmem:[#allocation3 + $0x1f0] sm:$0xff] }
  0x7f   :  { %1044 = vmatpush1.bf16.msra.mxu1 %v1043_v22  ;;  %v1255_v22 = vpack.c.bf16 %v669_v13, %v668_v12  ;;  %v283_v12 = vld [vmem:[#allocation3 + $0x6d8] sm:$0xff] }
  0x80   :  { %1046 = vmatprep.subr.bf16.mxu1 %v1045_v25  ;;  %v351_v25 = vcombine.high %v1472_v11, %v1472_v11  ;;  %v1261_v11 = vpack.c.bf16 %v689_v31, %v688_v30  ;;  %v293_v30 = vld [vmem:[#allocation3 + $0x728] sm:$0xff]  ;;  %v295_v31 = vld [vmem:[#allocation3 + $0x738] sm:$0xff] }
  0x81   :  { %1136 = vmatpush1.bf16.msra.mxu0 %v1135_v33  ;;  %v1047_v33 = vpack.c.bf16 %v126_v27, %v124_v26  ;;  %v1257_v26 = vpack.c.bf16 %v687_v18, %v686_v16  ;;  %v670_v27 = vld [vmem:[#allocation5 + $0x40] sm:$0xff]  ;;  %v282_v16 = vld [vmem:[#allocation3 + $0x6d0] sm:$0xff]  ;;  %v285_v18 = vld [vmem:[#allocation3 + $0x6e8] sm:$0xff] }
  0x82   :  { %1138 = vmatprep.subr.bf16.mxu0 %v1137_v39  ;;  %v663_v39 = vld [vmem:[#allocation5 + $0x8] sm:$0xff] }
  0x83   :  { %1048 = vmatpush1.bf16.msra.mxu1 %v1047_v33  ;;  %v259_v33 = vld [vmem:[#allocation3 + $0x618] sm:$0xff] }
  0x84   :  { %1242 = vmatprep.subr.bf16.mxu1 %v1241_v37  ;;  %v1491_v37 = vrot.slane %v351_v25, %v1455_v44  ;;  %v1181_v44 = vpack.c.bf16 %v263_v45, %v261_v43  ;;  %v289_v25 = vld [vmem:[#allocation3 + $0x708] sm:$0xff]  ;;  %v303_v45 = vld [vmem:[#allocation3 + $0x778] sm:$0xff] }
  0x85   :  { %1140 = vmatpush1.bf16.msra.mxu0 %v1139_v47  ;;  %v1243_v47 = vpack.c.bf16 %v663_v39, %v662_v38  ;;  %v672_v38 = vld [vmem:[#allocation5 + $0x50] sm:$0xff]  ;;  %v673_v39 = vld [vmem:[#allocation5 + $0x58] sm:$0xff]  ;;  %v301_v43 = vld [vmem:[#allocation3 + $0x768] sm:$0xff] }
  0x86   :  { %1142 = vmatprep.subr.bf16.mxu0 %v1141_v54  ;;  %v665_v54 = vld [vmem:[#allocation5 + $0x18] sm:$0xff]  ;;  %441 = vmatmul.mubr.f32.vlgmr.msra.gmra.mrb[0].mxu1 %v1476_v17  ;;  %v1167_v17 = vpack.c.bf16 %v246_v3, %v244_v62  ;;  %v1263_v46 = vpack.c.bf16 %v673_v39, %v672_v38  ;;  %v268_v62 = vld [vmem:[#allocation3 + $0x660] sm:$0xff] }
  0x87   :  { %1244 = vmatpush3.bf16.msra.mxu1 %v1243_v47  ;;  %v1179_v47 = vpack.c.bf16 %v258_v42, %v256_v41  ;;  %v272_v3 = vld [vmem:[#allocation3 + $0x680] sm:$0xff]  ;;  %v299_v38 = vld [vmem:[#allocation3 + $0x758] sm:$0xff]  ;;  %v298_v42 = vld [vmem:[#allocation3 + $0x750] sm:$0xff] }
  0x88   :  { %1246 = vmatprep.subr.bf16.mxu1 %v1245_v51  ;;  %v262_v51 = vld [vmem:[#allocation3 + $0x630] sm:$0xff]  ;;  %v296_v41 = vld [vmem:[#allocation3 + $0x740] sm:$0xff] }
  0x89   :  { %1144 = vmatpush1.bf16.msra.mxu0 %v1143_v60  ;;  %v1247_v60 = vpack.c.bf16 %v665_v54, %v664_v52  ;;  %v265_v52 = vld [vmem:[#allocation3 + $0x648] sm:$0xff]  ;;  %v267_v54 = vld [vmem:[#allocation3 + $0x658] sm:$0xff] }
  0x8a   :  { %1146 = vmatprep.subr.bf16.mxu0 %v1145_v1  ;;  %v667_v1 = vld [vmem:[#allocation5 + $0x28] sm:$0xff]  ;;  %v1185_v56 = vpack.c.bf16 %v267_v54, %v265_v52 }
  0x8b   :  { %1248 = vmatpush3.bf16.msra.mxu1 %v1247_v60  ;;  %v1187_v60 = vpack.c.bf16 %v266_v58, %v264_v57  ;;  %v309_v57 = vld [vmem:[#allocation3 + $0x7a8] sm:$0xff]  ;;  %v311_v58 = vld [vmem:[#allocation3 + $0x7b8] sm:$0xff] }
  0x8c   :  { %1250 = vmatprep.subr.bf16.mxu1 %v1249_v63  ;;  %v270_v63 = vld [vmem:[#allocation3 + $0x670] sm:$0xff] }
  0x8d   :  { %1148 = vmatpush1.bf16.msra.mxu0 %v1147_v8  ;;  %v1251_v8 = vpack.c.bf16 %v667_v1, %v666_v0  ;;  %v273_v0 = vld [vmem:[#allocation3 + $0x688] sm:$0xff]  ;;  %v275_v1 = vld [vmem:[#allocation3 + $0x698] sm:$0xff] }
  0x8e   :  { %1150 = vmatprep.subr.bf16.mxu0 %v1149_v14  ;;  %v1169_v14 = vpack.c.bf16 %v251_v7, %v249_v6  ;;  %v279_v6 = vld [vmem:[#allocation3 + $0x6b8] sm:$0xff]  ;;  %v1195_v7 = vpack.c.bf16 %v274_v4, %v272_v3  ;;  %v317_v3 = vld [vmem:[#allocation3 + $0x7e8] sm:$0xff] }
  0x8f   :  { %1252 = vmatpush3.bf16.msra.mxu1 %v1251_v8  ;;  %v1197_v8 = vpack.c.bf16 %v279_v6, %v277_v5  ;;  %v319_v4 = vld [vmem:[#allocation3 + $0x7f8] sm:$0xff] }
  0x90   :  { %1254 = vmatprep.subr.bf16.mxu1 %v1253_v10  ;;  %v281_v10 = vld [vmem:[#allocation3 + $0x6c8] sm:$0xff]  ;;  %v1237_v6 = vpack.c.bf16 %v319_v4, %v317_v3 }
  0x91   :  { %1152 = vmatpush1.bf16.msra.mxu0 %v1151_v23  ;;  %v1171_v23 = vpack.c.bf16 %v250_v15, %v248_v9  ;;  %v278_v9 = vld [vmem:[#allocation3 + $0x6b0] sm:$0xff]  ;;  %v280_v15 = vld [vmem:[#allocation3 + $0x6c0] sm:$0xff] }
  0x92   :  { %1154 = vmatprep.subr.bf16.mxu0 %v1153_v48  ;;  %v671_v48 = vld [vmem:[#allocation5 + $0x48] sm:$0xff]  ;;  %v1203_v21 = vpack.c.bf16 %v282_v16, %v280_v15  ;;  %v692_v16 = vld [vmem:[#allocation5 + $0xf0] sm:$0xff] }
  0x93   :  { %1256 = vmatpush3.bf16.msra.mxu1 %v1255_v22  ;;  %v1205_v22 = vpack.c.bf16 %v287_v20, %v285_v18  ;;  %v693_v18 = vld [vmem:[#allocation5 + $0xf8] sm:$0xff] }
  0x94   :  { %1258 = vmatprep.subr.bf16.mxu1 %v1257_v26  ;;  %v291_v26 = vld [vmem:[#allocation3 + $0x718] sm:$0xff]  ;;  %v1269_v20 = vpack.c.bf16 %v693_v18, %v692_v16 }
  0x95   :  { %1156 = vmatpush1.bf16.msra.mxu0 %v1155_v34  ;;  %v1259_v34 = vpack.c.bf16 %v671_v48, %v670_v27  ;;  %v1209_v48 = vpack.c.bf16 %v291_v26, %v289_v25  ;;  %v324_v26 = vsub.s32 0, %v1452_v36 }
  0x96   :  { %1158 = vmatprep.subr.bf16.mxu0 %v1157_v40  ;;  %v1177_v40 = vpack.c.bf16 %v259_v33, %v257_v32  ;;  %v1213_v33 = vpack.c.bf16 %v295_v31, %v293_v30 }
  0x97   :  { %1260 = vmatpush3.bf16.msra.mxu1 %v1259_v34  ;;  %v292_v34 = vld [vmem:[#allocation3 + $0x720] sm:$0xff] }
  0x98   :  { %1262 = vmatprep.subr.bf16.mxu1 %v1261_v11  ;;  %v297_v11 = vld [vmem:[#allocation3 + $0x748] sm:$0xff] }
  0x99   :  { %1160 = vmatpush1.bf16.msra.mxu0 %v1159_v49  ;;  %v367_v49 = vcombine.high %v1491_v37, %v1491_v37 }
  0x9a   :  { %1162 = vmatprep.subr.bf16.mxu0 %v1161_v55  ;;  %v1183_v55 = vpack.c.bf16 %v262_v51, %v260_v50  ;;  %v305_v50 = vld [vmem:[#allocation3 + $0x788] sm:$0xff]  ;;  %v307_v51 = vld [vmem:[#allocation3 + $0x798] sm:$0xff] }
  0x9b   :  { %1264 = vmatpush3.bf16.msra.mxu1 %v1263_v46  ;;  %v1219_v46 = vpack.c.bf16 %v298_v42, %v296_v41  ;;  %v1225_v54 = vpack.c.bf16 %v307_v51, %v305_v50  ;;  %v775_v42 = vld [vmem:[%s1567_s5 + $0x18] sm:$0xff]  ;;  %v780_v51 = vld [vmem:[%s1567_s5 + $0x40] sm:$0xff] }
  0x9d   :  { %1164 = vmatpush1.bf16.msra.mxu0 %v1163_v61  ;;  %v1189_v61 = vpack.c.bf16 %v271_v53, %v269_v59  ;;  %v1229_v53 = vpack.c.bf16 %v311_v58, %v309_v57  ;;  %v784_v58 = vld [vmem:[%s1567_s5 + $0x60] sm:$0xff] }
  0x9e   :  { %1166 = vmatprep.subr.bf16.mxu0 %v1165_v2  ;;  %v1193_v2 = vpack.c.bf16 %v275_v1, %v273_v0 }
  0xa1   :  { %1168 = vmatpush1.bf16.msra.mxu0 %v1167_v17  ;;  %v276_v17 = vld [vmem:[#allocation3 + $0x6a0] sm:$0xff] }
  0xa2   :  { %1170 = vmatprep.subr.bf16.mxu0 %v1169_v14  ;;  %v1199_v13 = vpack.c.bf16 %v278_v9, %v276_v17  ;;  %v1201_v14 = vpack.c.bf16 %v283_v12, %v281_v10  ;;  %v690_v9 = vld [vmem:[#allocation5 + $0xe0] sm:$0xff]  ;;  %v691_v10 = vld [vmem:[#allocation5 + $0xe8] sm:$0xff] }
  0xa3   :  { %v1265_v12 = vpack.c.bf16 %v691_v10, %v690_v9 }
  0xa5   :  { %1172 = vmatpush1.bf16.msra.mxu0 %v1171_v23  ;;  %v284_v23 = vld [vmem:[#allocation3 + $0x6e0] sm:$0xff]  ;;  %1266 = vmatprep.subr.bf16.mxu1 %v1265_v12 }
  0xa6   :  { %1174 = vmatprep.subr.bf16.mxu0 %v1173_v28  ;;  %v1207_v27 = vpack.c.bf16 %v286_v24, %v284_v23  ;;  %v288_v28 = vld [vmem:[#allocation3 + $0x700] sm:$0xff]  ;;  %v1372_v24 = vmov 0.0|0.0  }
  0xa7   :  { %v1211_v32 = vpack.c.bf16 %v290_v29, %v288_v28 }
  0xa9   :  { %1176 = vmatpush1.bf16.msra.mxu0 %v1175_v35  ;;  %v294_v35 = vld [vmem:[#allocation3 + $0x730] sm:$0xff] }
  0xaa   :  { %1178 = vmatprep.subr.bf16.mxu0 %v1177_v40  ;;  %v1215_v39 = vpack.c.bf16 %v294_v35, %v292_v34  ;;  %v1217_v40 = vpack.c.bf16 %v299_v38, %v297_v11  ;;  %v772_v35 = vld [vmem:[%s1567_s5] sm:$0xff]  ;;  %v773_v11 = vld [vmem:[%s1567_s5 + $0x8] sm:$0xff] }
  0xac   :  { %583 = vmatmul.mubr.f32.vlgmr.msra.gmra.mrb[0].mxu0 %v1480_v19  ;;  %v1191_v19 = vpack.c.bf16 %v270_v63, %v268_v62  ;;  %v313_v62 = vld [vmem:[#allocation3 + $0x7c8] sm:$0xff]  ;;  %v315_v63 = vld [vmem:[#allocation3 + $0x7d8] sm:$0xff] }
  0xad   :  { %1180 = vmatpush1.bf16.msra.mxu0 %v1179_v47  ;;  %653 = vmatprep.mubr.f32.mxu0 %v367_v49  ;;  %v1221_v47 = vpack.c.bf16 %v303_v45, %v301_v43  ;;  %v300_v49 = vld [vmem:[#allocation3 + $0x760] sm:$0xff]  ;;  %v1233_v1 = vpack.c.bf16 %v315_v63, %v313_v62  ;;  %v1374_v63 = vmov 0.0  }
  0xae   :  { %1182 = vmatprep.subr.bf16.mxu0 %v1181_v44  ;;  %v302_v44 = vld [vmem:[#allocation3 + $0x770] sm:$0xff]  ;;  %v776_v45 = vld [vmem:[%s1567_s5 + $0x20] sm:$0xff] }
  0xaf   :  { %v1223_v52 = vpack.c.bf16 %v302_v44, %v300_v49  ;;  %v778_v49 = vld [vmem:[%s1567_s5 + $0x30] sm:$0xff]  ;;  %v779_v44 = vld [vmem:[%s1567_s5 + $0x38] sm:$0xff] }
  0xb0   :  { %v1283_v50 = vpack.c.bf16 %v779_v44, %v778_v49 }
  0xb1   :  { %1184 = vmatpush1.bf16.msra.mxu0 %v1183_v55  ;;  %v304_v55 = vld [vmem:[#allocation3 + $0x780] sm:$0xff] }
  0xb2   :  { %1186 = vmatprep.subr.bf16.mxu0 %v1185_v56  ;;  %v306_v56 = vld [vmem:[#allocation3 + $0x790] sm:$0xff] }
  0xb3   :  { %v1227_v59 = vpack.c.bf16 %v306_v56, %v304_v55  ;;  %v782_v55 = vld [vmem:[%s1567_s5 + $0x50] sm:$0xff]  ;;  %v783_v56 = vld [vmem:[%s1567_s5 + $0x58] sm:$0xff] }
  0xb4   :  { %v1289_v57 = vpack.c.bf16 %v783_v56, %v782_v55 }
  0xb5   :  { %1188 = vmatpush1.bf16.msra.mxu0 %v1187_v60  ;;  %v308_v60 = vld [vmem:[#allocation3 + $0x7a0] sm:$0xff] }
  0xb6   :  { %1190 = vmatprep.subr.bf16.mxu0 %v1189_v61  ;;  %v310_v61 = vld [vmem:[#allocation3 + $0x7b0] sm:$0xff] }
  0xb7   :  { %v1231_v0 = vpack.c.bf16 %v310_v61, %v308_v60  ;;  %v786_v60 = vld [vmem:[%s1567_s5 + $0x70] sm:$0xff]  ;;  %v787_v61 = vld [vmem:[%s1567_s5 + $0x78] sm:$0xff] }
  0xb8   :  { %v1295_v62 = vpack.c.bf16 %v787_v61, %v786_v60 }
  0xb9   :  { %1192 = vmatpush1.bf16.msra.mxu0 %v1191_v19  ;;  %v312_v19 = vld [vmem:[#allocation3 + $0x7c0] sm:$0xff] }
  0xba   :  { %1194 = vmatprep.subr.bf16.mxu0 %v1193_v2  ;;  %v314_v2 = vld [vmem:[#allocation3 + $0x7d0] sm:$0xff] }
  0xbb   :  { %v1235_v5 = vpack.c.bf16 %v314_v2, %v312_v19 }
  0xbd   :  { %1196 = vmatpush1.bf16.msra.mxu0 %v1195_v7  ;;  %v316_v7 = vld [vmem:[#allocation3 + $0x7e0] sm:$0xff] }
  0xbe   :  { %1198 = vmatprep.subr.bf16.mxu0 %v1197_v8  ;;  %v318_v8 = vld [vmem:[#allocation3 + $0x7f0] sm:$0xff] }
  0xbf   :  { %v1239_v17 = vpack.c.bf16 %v318_v8, %v316_v7 }
  0xc1   :  { %1200 = vmatpush1.bf16.msra.mxu0 %v1199_v13  ;;  %v674_v13 = vld [vmem:[#allocation5 + $0x60] sm:$0xff] }
  0xc2   :  { %1202 = vmatprep.subr.bf16.mxu0 %v1201_v14  ;;  %v675_v14 = vld [vmem:[#allocation5 + $0x68] sm:$0xff] }
  0xc3   :  { %v1267_v15 = vpack.c.bf16 %v675_v14, %v674_v13  ;;  %v897_v13 = vld [vmem:[#allocation2] ss:$0 sm:$0xff] }
  0xc5   :  { %1204 = vmatpush1.bf16.msra.mxu0 %v1203_v21  ;;  %1268 = vmatpush3.bf16.msra.mxu1 %v1267_v15  ;;  %v676_v21 = vld [vmem:[#allocation5 + $0x70] sm:$0xff] }
  0xc6   :  { %1206 = vmatprep.subr.bf16.mxu0 %v1205_v22  ;;  %v677_v22 = vld [vmem:[#allocation5 + $0x78] sm:$0xff]  ;;  %1270 = vmatprep.subr.bf16.mxu1 %v1269_v20 }
  0xc7   :  { %v1271_v23 = vpack.c.bf16 %v677_v22, %v676_v21 }
  0xc9   :  { %1208 = vmatpush1.bf16.msra.mxu0 %v1207_v27  ;;  %1272 = vmatpush3.bf16.msra.mxu1 %v1271_v23  ;;  %v320_v27 = vld [vmem:[%s1564_s2] sm:$0x3] }
  0xca   :  { %1210 = vmatprep.subr.bf16.mxu0 %v1209_v48  ;;  %1273 = vmatprep.subr.bf16.mxu1 %v1372_v24  ;;  %v328_v48 = vsub.s32 1, %v1452_v36  ;;  %v325_v28 = vrot.slane %v320_v27, %v324_v26  ;;  %v774_v36 = vld [vmem:[%s1567_s5 + $0x10] sm:$0xff] }
  0xcb   :  { %v1277_v43 = vpack.c.bf16 %v775_v42, %v774_v36 }
  0xcc   :  { %v329_v29 = vrot.slane %v320_v27, %v328_v48 }
  0xcd   :  { %1212 = vmatpush1.bf16.msra.mxu0 %v1211_v32 }
  0xce   :  { %1214 = vmatprep.subr.bf16.mxu0 %v1213_v33 }
  0xd1   :  { %1216 = vmatpush1.bf16.msra.mxu0 %v1215_v39 }
  0xd2   :  { %1218 = vmatprep.subr.bf16.mxu0 %v1217_v40  ;;  %v1274_v40 = vpack.c.bf16 %v773_v11, %v772_v35 }
  0xd5   :  { %1220 = vmatpush1.bf16.msra.mxu0 %v1219_v46  ;;  %v777_v46 = vld [vmem:[%s1567_s5 + $0x28] sm:$0xff] }
  0xd6   :  { %1222 = vmatprep.subr.bf16.mxu0 %v1221_v47  ;;  %v1280_v47 = vpack.c.bf16 %v777_v46, %v776_v45 }
  0xd9   :  { %1224 = vmatpush1.bf16.msra.mxu0 %v1223_v52  ;;  %v781_v52 = vld [vmem:[%s1567_s5 + $0x48] sm:$0xff] }
  0xda   :  { %1226 = vmatprep.subr.bf16.mxu0 %v1225_v54  ;;  %v1286_v54 = vpack.c.bf16 %v781_v52, %v780_v51 }
  0xdd   :  { %1228 = vmatpush1.bf16.msra.mxu0 %v1227_v59  ;;  %v785_v59 = vld [vmem:[%s1567_s5 + $0x68] sm:$0xff] }
  0xde   :  { %1230 = vmatprep.subr.bf16.mxu0 %v1229_v53  ;;  %v1292_v53 = vpack.c.bf16 %v785_v59, %v784_v58 }
  0xe1   :  { %1232 = vmatpush1.bf16.msra.mxu0 %v1231_v0 }
  0xe2   :  { %1234 = vmatprep.subr.bf16.mxu0 %v1233_v1  ;;  %v894_v1 = vld [vmem:[%s1566_s4] ss:$0 sm:$0xff] }
  0xe5   :  { %1236 = vmatpush1.bf16.msra.mxu0 %v1235_v5  ;;  %v895_v5 = vld [vmem:[%s1568_s6] ss:$0 sm:$0xff] }
  0xe6   :  { %1238 = vmatprep.subr.bf16.mxu0 %v1237_v6 }
  0xe9   :  { %1240 = vmatpush1.bf16.msra.mxu0 %v1239_v17  ;;  %v896_v17 = vld [vmem:[%s1569_s7] ss:$0 sm:$0xff] }
  0xec   :  { %654 = vmatmul.mubr.f32.vlgmr.msra.gmra.mrb[0].mxu0 %v1491_v37 }
 0x159   :  { %v442_v25 = vpop.f32.mrb[0].mxu1 }
 0x15a   :  { %v444_v37 = vpop.f32.mrb[1].mxu1  ;;  %v443_v30 = vadd.f32 %v442_v25, %v325_v28 }
 0x15b   :  { %v445_v31 = vadd.f32 %v444_v37, %v329_v29 }
 0x1bf   :  { %v655_v32 = vpop.f32.mrb[0].mxu0 }
 0x1c0   :  { %v1298_v33 = vadd.f32 %v655_v32, %v443_v30  ;;  %v657_v34 = vpop.f32.mrb[1].mxu0 }
 0x1c1   :  { %v1300_v38 = vadd.f32 %v657_v34, %v445_v31 }
 0x1c2   :  { %v660_v41 = vmax.f32 %v1298_v33, 0.0 }
 0x1c3   :  { %v661_v39 = vmax.f32 %v1300_v38, 0.0 }
 0x1c5   :  { %765 = vmatprep.mubr.f32.mxu1 %v661_v39 }
 0x1c6   :  { %766 = vmatmul.mubr.f32.vlgmr.msra.gmra.mrb[2].mxu1 %v660_v41 }
 0x1c7   :  { %1275 = vmatpush3.bf16.msra.mxu1 %v1274_v40  ;;  %982 = vmatprep.mubr.msk.f32.mxu1 %vm1373_vm0, %v1374_v63 }
 0x1c8   :  { %1276 = vmatprep.subr.bf16.mxu1 %v1372_v24 }
 0x1cb   :  { %1278 = vmatpush3.bf16.msra.mxu1 %v1277_v43 }
 0x1cc   :  { %1279 = vmatprep.subr.bf16.mxu1 %v1372_v24 }
 0x1cf   :  { %1281 = vmatpush3.bf16.msra.mxu1 %v1280_v47 }
 0x1d0   :  { %1282 = vmatprep.subr.bf16.mxu1 %v1372_v24 }
 0x1d3   :  { %1284 = vmatpush3.bf16.msra.mxu1 %v1283_v50 }
 0x1d4   :  { %1285 = vmatprep.subr.bf16.mxu1 %v1372_v24 }
 0x1d7   :  { %1287 = vmatpush3.bf16.msra.mxu1 %v1286_v54 }
 0x1d8   :  { %1288 = vmatprep.subr.bf16.mxu1 %v1372_v24 }
 0x1db   :  { %1290 = vmatpush3.bf16.msra.mxu1 %v1289_v57 }
 0x1dc   :  { %1291 = vmatprep.subr.bf16.mxu1 %v1372_v24 }
 0x1df   :  { %1293 = vmatpush3.bf16.msra.mxu1 %v1292_v53 }
 0x1e0   :  { %1294 = vmatprep.subr.bf16.mxu1 %v1372_v24 }
 0x1e3   :  { %1296 = vmatpush3.bf16.msra.mxu1 %v1295_v62 }
 0x299   :  { %v930_v0 = vpop.f32.mrb[2].mxu1 }
 0x29a   :  { %v931_v19 = vpop.f32.mrb[3].mxu1 }
 0x29b   :  { %v932_v2 = vadd.f32 %v931_v19, %v930_v0 }
 0x29d   :  { %v768_v3 = vadd.f32 %v932_v2, %v894_v1 }
 0x29f   :  { %v771_v4 = vmax.f32 %v768_v3, 0.0 }
 0x2a1   :  { %983 = vmatmul.mubr.f32.vlgmr.msra.gmra.mrb[4].mxu1 %v771_v4 }
 0x374   :  { %v861_v6 = vpop.f32.mrb[4].mxu1 }
 0x375   :  { %v862_v7 = vadd.f32 %v895_v5, %v861_v6  ;;  %v984_v8 = vpop.f32.mrb[5].mxu1 }
 0x377   :  { %v865_v9 = vmax.f32 %v862_v7, 0.0 }
 0x379   :  { %v873_v10 = vmul.f32 %v896_v17, %v865_v9 }
 0x37b   :  { %v875_v12 = vsel %vm874_vm1, %v873_v10, 0.0 }
 0x37c   :  { %876 = vadd.xlane.f32.xlu0 %v875_v12 }
 0x409   :  { %v877_v14 = vpop.xlane.xlu0 %876 }
 0x40a   :  { %v885_v15 = vadd.f32 %v897_v13, %v877_v14 }
 0x40c   :  { %887 = vst.msk [vmem:[%s1571_s9] sm:$0x3] %vm886_vm2, %v885_v15 }
 0x40d   :  { %892 = vsyncpa [#allocation4], 1 }
 0x40e   :  { %893 = vsyncpa [#allocation6], 1 }

</bundles_post_ra>
